<compile_context>
chip_gen: v7x
topology: tpu7x:2x2x1
jax: 0.10.0
libtpu: 0.0.40
codegen_flags: <defaults>
</compile_context>

<pallas_src>
import jax
import jax.numpy as jnp
from jax import lax
from jax.experimental import pallas as pl
from jax.experimental.pallas import tpu as pltpu

LANE = 128


def _ff_kernel(x_ref, w1_ref, b1_ref, w2_ref, b2_ref, o_ref):
    # x_ref : (1, Cin,  R, 128)  VMEM   (tokens dense on sublanes x lanes)
    # w1_ref: (Cin, Chid)        SMEM
    # b1_ref: (Chid,)            SMEM
    # w2_ref: (Chid, Cout)       SMEM
    # b2_ref: (Cout,)            SMEM
    # o_ref : (1, Cout, R, 128)  VMEM
    cin, chid = w1_ref.shape
    cout = w2_ref.shape[1]
    r_blk = x_ref.shape[2]

    # 8 sublane rows per chunk => one f32 vreg per channel per chunk.
    chunk = 8 if (r_blk % 8 == 0) else r_blk
    n_chunks = r_blk // chunk

    # Hoist every SMEM scalar read and bias splat out of the chunk loop
    # (JAX does not CSE scalar loads / broadcast_in_dim across iterations).
    w1 = [[w1_ref[ci, hh] for hh in range(chid)] for ci in range(cin)]
    w2 = [[w2_ref[hh, co] for co in range(cout)] for hh in range(chid)]
    b1 = [jnp.full((chunk, LANE), b1_ref[hh], jnp.float32) for hh in range(chid)]
    b2 = [jnp.full((chunk, LANE), b2_ref[co], jnp.float32) for co in range(cout)]

    def body(c, carry):
        r0 = pl.multiple_of(c * chunk, chunk)
        xs = [x_ref[0, ci, pl.ds(r0, chunk), :].astype(jnp.float32)
              for ci in range(cin)]                      # Cin vregs live
        acc = [b2[co] for co in range(cout)]             # Cout accumulators
        for hh in range(chid):
            t = b1[hh]
            for ci in range(cin):
                t = t + xs[ci] * w1[ci][hh]              # VPU broadcast-FMA
            t = jnp.maximum(t, 0.0)                      # ReLU; dropout = identity (eval)
            for co in range(cout):
                acc[co] = acc[co] + t * w2[hh][co]
        for co in range(cout):
            o_ref[0, co, pl.ds(r0, chunk), :] = acc[co].astype(o_ref.dtype)
        return carry

    unroll = True if n_chunks <= 8 else 2
    lax.fori_loop(0, n_chunks, body, 0, unroll=unroll)


def feed_forward_pallas(x_nchw, w1, b1, w2, b2, *, r_max=1024):
    """Fused 1x1conv -> ReLU -> (eval) dropout -> 1x1conv.

    x_nchw: (N, Cin, H, W); w1: (Cin, Chid); b1: (Chid,);
    w2: (Chid, Cout); b2: (Cout,).
    """
    N, Cin, H, W = x_nchw.shape
    Chid = w1.shape[1]
    Cout = w2.shape[1]
    M = H * W

    # Fold tokens onto (sublane, lane): (N, Cin, rows, 128).  Only pad the
    # token axis to the next multiple of 128; ragged row tiles are handled by
    # Pallas's masked boundary blocks, so no full-tile pad / output slice.
    M_pad = pl.cdiv(M, LANE) * LANE
    x3d = x_nchw.reshape(N, Cin, M)
    if M_pad != M:
        x3d = jnp.pad(x3d, ((0, 0), (0, 0), (0, M_pad - M)))
    rows = M_pad // LANE
    x4d = x3d.reshape(N, Cin, rows, LANE)

    # Row-tile size: big enough that each grid step moves MiBs (per-step
    # overhead ~0.35us), small enough that double-buffered in+out stays far
    # under v7x's 64 MiB VMEM (r_max=1024 -> 2 MiB in + 2 MiB out per step).
    if rows <= r_max:
        if N == 1 and rows >= 16:
            # Split the token axis so both v7x TensorCores get work.
            r_blk = max(8, (((rows + 1) // 2) // 8) * 8)
        else:
            r_blk = rows  # block dim == full array dim: always legal
    else:
        r_blk = r_max

    grid = (N, pl.cdiv(rows, r_blk))

    # Scalar weights/biases live in SMEM (32-bit words), fetched once.
    w1f = w1.astype(jnp.float32)
    b1f = b1.astype(jnp.float32)
    w2f = w2.astype(jnp.float32)
    b2f = b2.astype(jnp.float32)
    smem_spec = pl.BlockSpec(memory_space=pltpu.MemorySpace.SMEM)

    flops = 2 * N * M_pad * (Cin * Chid + Chid * Cout)
    bytes_accessed = (
        x4d.size * x4d.dtype.itemsize
        + N * M_pad * Cout * x_nchw.dtype.itemsize
        + (w1f.size + b1f.size + w2f.size + b2f.size) * 4
    )

    out4d = pl.pallas_call(
        _ff_kernel,
        out_shape=jax.ShapeDtypeStruct((N, Cout, rows, LANE), x_nchw.dtype),
        grid=grid,
        in_specs=[
            pl.BlockSpec((1, Cin, r_blk, LANE), lambda n, r: (n, 0, r, 0)),
            smem_spec,  # w1
            smem_spec,  # b1
            smem_spec,  # w2
            smem_spec,  # b2
        ],
        out_specs=pl.BlockSpec((1, Cout, r_blk, LANE), lambda n, r: (n, 0, r, 0)),
        compiler_params=pltpu.CompilerParams(
            dimension_semantics=("parallel", "parallel"),
            vmem_limit_bytes=32 * 1024 * 1024,
        ),
        cost_estimate=pl.CostEstimate(
            flops=flops, transcendentals=0, bytes_accessed=bytes_accessed
        ),
    )(x4d, w1f, b1f, w2f, b2f)

    out3d = out4d.reshape(N, Cout, M_pad)
    if M_pad != M:
        out3d = out3d[:, :, :M]
    return out3d.reshape(N, Cout, H, W)


if __name__ == "__main__":
    # Module config: in_channels=4, out_channels=4, ch_mult=4 -> hidden=16
    N, Cin, H, W = 2, 4, 16, 16
    ch_mult = 4
    Chid = Cin * ch_mult
    Cout = 4

    key = jax.random.PRNGKey(0)
    kx, kw1, kb1, kw2, kb2 = jax.random.split(key, 5)

    x = jax.random.normal(kx, (N, Cin, H, W), dtype=jnp.float32)

    # Conv2d(kernel_size=1) weights are (out, in, 1, 1) in PyTorch; here we
    # directly build the equivalent (in, out) matmul weights, deterministically.
    w1 = jax.random.normal(kw1, (Cin, Chid), dtype=jnp.float32) * 0.1
    b1 = jax.random.normal(kb1, (Chid,), dtype=jnp.float32) * 0.1
    w2 = jax.random.normal(kw2, (Chid, Cout), dtype=jnp.float32) * 0.1
    b2 = jax.random.normal(kb2, (Cout,), dtype=jnp.float32) * 0.1

    out = feed_forward_pallas(x, w1, b1, w2, b2)
    jax.block_until_ready(out)

    # Reference check in plain JAX (1x1 conv == per-pixel matmul over channels).
    x2d = jnp.transpose(x, (0, 2, 3, 1)).reshape(-1, Cin)
    ref = jnp.maximum(x2d @ w1 + b1, 0.0) @ w2 + b2
    ref = ref.reshape(N, H, W, Cout).transpose(0, 3, 1, 2)

    assert out.shape == (N, Cout, H, W)
    assert jnp.allclose(out, ref, atol=1e-5, rtol=1e-5), float(
        jnp.max(jnp.abs(out - ref))
    )

    print("KERNEL_OK")
</pallas_src>

<mosaic_0001>
module attributes {stable_mosaic.version = 11 : i64} {
  func.func @_ff_kernel(%arg0: i32, %arg1: i32, %arg2: memref<1x4x2x128xf32, #tpu.memory_space<vmem>>, %arg3: memref<4x16xf32, #tpu.memory_space<smem>>, %arg4: memref<16xf32, #tpu.memory_space<smem>>, %arg5: memref<16x4xf32, #tpu.memory_space<smem>>, %arg6: memref<4xf32, #tpu.memory_space<smem>>, %arg7: memref<1x4x2x128xf32, #tpu.memory_space<vmem>>) attributes {dimension_semantics = [#tpu.dimension_semantics<parallel>, #tpu.dimension_semantics<parallel>], iteration_bounds = array<i64: 2, 1>, scalar_prefetch = 0 : i64, scratch_operands = 0 : i64, tpu.core_type = #tpu.core_type<tc>, window_params = [{transform_indices = @transform_0, window_bounds = array<i64: 1, 4, 2, 128>}, {transform_indices = @transform_1, window_bounds = array<i64: 4, 16>}, {transform_indices = @transform_2, window_bounds = array<i64: 16>}, {transform_indices = @transform_3, window_bounds = array<i64: 16, 4>}, {transform_indices = @transform_4, window_bounds = array<i64: 4>}, {transform_indices = @transform_5, window_bounds = array<i64: 1, 4, 2, 128>}]} {
    %c0 = arith.constant 0 : index
    %c0_0 = arith.constant 0 : index
    %0 = memref.load %arg3[%c0, %c0_0] : memref<4x16xf32, #tpu.memory_space<smem>>
    %c0_1 = arith.constant 0 : index
    %c1 = arith.constant 1 : index
    %1 = memref.load %arg3[%c0_1, %c1] : memref<4x16xf32, #tpu.memory_space<smem>>
    %c0_2 = arith.constant 0 : index
    %c2 = arith.constant 2 : index
    %2 = memref.load %arg3[%c0_2, %c2] : memref<4x16xf32, #tpu.memory_space<smem>>
    %c0_3 = arith.constant 0 : index
    %c3 = arith.constant 3 : index
    %3 = memref.load %arg3[%c0_3, %c3] : memref<4x16xf32, #tpu.memory_space<smem>>
    %c0_4 = arith.constant 0 : index
    %c4 = arith.constant 4 : index
    %4 = memref.load %arg3[%c0_4, %c4] : memref<4x16xf32, #tpu.memory_space<smem>>
    %c0_5 = arith.constant 0 : index
    %c5 = arith.constant 5 : index
    %5 = memref.load %arg3[%c0_5, %c5] : memref<4x16xf32, #tpu.memory_space<smem>>
    %c0_6 = arith.constant 0 : index
    %c6 = arith.constant 6 : index
    %6 = memref.load %arg3[%c0_6, %c6] : memref<4x16xf32, #tpu.memory_space<smem>>
    %c0_7 = arith.constant 0 : index
    %c7 = arith.constant 7 : index
    %7 = memref.load %arg3[%c0_7, %c7] : memref<4x16xf32, #tpu.memory_space<smem>>
    %c0_8 = arith.constant 0 : index
    %c8 = arith.constant 8 : index
    %8 = memref.load %arg3[%c0_8, %c8] : memref<4x16xf32, #tpu.memory_space<smem>>
    %c0_9 = arith.constant 0 : index
    %c9 = arith.constant 9 : index
    %9 = memref.load %arg3[%c0_9, %c9] : memref<4x16xf32, #tpu.memory_space<smem>>
    %c0_10 = arith.constant 0 : index
    %c10 = arith.constant 10 : index
    %10 = memref.load %arg3[%c0_10, %c10] : memref<4x16xf32, #tpu.memory_space<smem>>
    %c0_11 = arith.constant 0 : index
    %c11 = arith.constant 11 : index
    %11 = memref.load %arg3[%c0_11, %c11] : memref<4x16xf32, #tpu.memory_space<smem>>
    %c0_12 = arith.constant 0 : index
    %c12 = arith.constant 12 : index
    %12 = memref.load %arg3[%c0_12, %c12] : memref<4x16xf32, #tpu.memory_space<smem>>
    %c0_13 = arith.constant 0 : index
    %c13 = arith.constant 13 : index
    %13 = memref.load %arg3[%c0_13, %c13] : memref<4x16xf32, #tpu.memory_space<smem>>
    %c0_14 = arith.constant 0 : index
    %c14 = arith.constant 14 : index
    %14 = memref.load %arg3[%c0_14, %c14] : memref<4x16xf32, #tpu.memory_space<smem>>
    %c0_15 = arith.constant 0 : index
    %c15 = arith.constant 15 : index
    %15 = memref.load %arg3[%c0_15, %c15] : memref<4x16xf32, #tpu.memory_space<smem>>
    %c1_16 = arith.constant 1 : index
    %c0_17 = arith.constant 0 : index
    %16 = memref.load %arg3[%c1_16, %c0_17] : memref<4x16xf32, #tpu.memory_space<smem>>
    %c1_18 = arith.constant 1 : index
    %c1_19 = arith.constant 1 : index
    %17 = memref.load %arg3[%c1_18, %c1_19] : memref<4x16xf32, #tpu.memory_space<smem>>
    %c1_20 = arith.constant 1 : index
    %c2_21 = arith.constant 2 : index
    %18 = memref.load %arg3[%c1_20, %c2_21] : memref<4x16xf32, #tpu.memory_space<smem>>
    %c1_22 = arith.constant 1 : index
    %c3_23 = arith.constant 3 : index
    %19 = memref.load %arg3[%c1_22, %c3_23] : memref<4x16xf32, #tpu.memory_space<smem>>
    %c1_24 = arith.constant 1 : index
    %c4_25 = arith.constant 4 : index
    %20 = memref.load %arg3[%c1_24, %c4_25] : memref<4x16xf32, #tpu.memory_space<smem>>
    %c1_26 = arith.constant 1 : index
    %c5_27 = arith.constant 5 : index
    %21 = memref.load %arg3[%c1_26, %c5_27] : memref<4x16xf32, #tpu.memory_space<smem>>
    %c1_28 = arith.constant 1 : index
    %c6_29 = arith.constant 6 : index
    %22 = memref.load %arg3[%c1_28, %c6_29] : memref<4x16xf32, #tpu.memory_space<smem>>
    %c1_30 = arith.constant 1 : index
    %c7_31 = arith.constant 7 : index
    %23 = memref.load %arg3[%c1_30, %c7_31] : memref<4x16xf32, #tpu.memory_space<smem>>
    %c1_32 = arith.constant 1 : index
    %c8_33 = arith.constant 8 : index
    %24 = memref.load %arg3[%c1_32, %c8_33] : memref<4x16xf32, #tpu.memory_space<smem>>
    %c1_34 = arith.constant 1 : index
    %c9_35 = arith.constant 9 : index
    %25 = memref.load %arg3[%c1_34, %c9_35] : memref<4x16xf32, #tpu.memory_space<smem>>
    %c1_36 = arith.constant 1 : index
    %c10_37 = arith.constant 10 : index
    %26 = memref.load %arg3[%c1_36, %c10_37] : memref<4x16xf32, #tpu.memory_space<smem>>
    %c1_38 = arith.constant 1 : index
    %c11_39 = arith.constant 11 : index
    %27 = memref.load %arg3[%c1_38, %c11_39] : memref<4x16xf32, #tpu.memory_space<smem>>
    %c1_40 = arith.constant 1 : index
    %c12_41 = arith.constant 12 : index
    %28 = memref.load %arg3[%c1_40, %c12_41] : memref<4x16xf32, #tpu.memory_space<smem>>
    %c1_42 = arith.constant 1 : index
    %c13_43 = arith.constant 13 : index
    %29 = memref.load %arg3[%c1_42, %c13_43] : memref<4x16xf32, #tpu.memory_space<smem>>
    %c1_44 = arith.constant 1 : index
    %c14_45 = arith.constant 14 : index
    %30 = memref.load %arg3[%c1_44, %c14_45] : memref<4x16xf32, #tpu.memory_space<smem>>
    %c1_46 = arith.constant 1 : index
    %c15_47 = arith.constant 15 : index
    %31 = memref.load %arg3[%c1_46, %c15_47] : memref<4x16xf32, #tpu.memory_space<smem>>
    %c2_48 = arith.constant 2 : index
    %c0_49 = arith.constant 0 : index
    %32 = memref.load %arg3[%c2_48, %c0_49] : memref<4x16xf32, #tpu.memory_space<smem>>
    %c2_50 = arith.constant 2 : index
    %c1_51 = arith.constant 1 : index
    %33 = memref.load %arg3[%c2_50, %c1_51] : memref<4x16xf32, #tpu.memory_space<smem>>
    %c2_52 = arith.constant 2 : index
    %c2_53 = arith.constant 2 : index
    %34 = memref.load %arg3[%c2_52, %c2_53] : memref<4x16xf32, #tpu.memory_space<smem>>
    %c2_54 = arith.constant 2 : index
    %c3_55 = arith.constant 3 : index
    %35 = memref.load %arg3[%c2_54, %c3_55] : memref<4x16xf32, #tpu.memory_space<smem>>
    %c2_56 = arith.constant 2 : index
    %c4_57 = arith.constant 4 : index
    %36 = memref.load %arg3[%c2_56, %c4_57] : memref<4x16xf32, #tpu.memory_space<smem>>
    %c2_58 = arith.constant 2 : index
    %c5_59 = arith.constant 5 : index
    %37 = memref.load %arg3[%c2_58, %c5_59] : memref<4x16xf32, #tpu.memory_space<smem>>
    %c2_60 = arith.constant 2 : index
    %c6_61 = arith.constant 6 : index
    %38 = memref.load %arg3[%c2_60, %c6_61] : memref<4x16xf32, #tpu.memory_space<smem>>
    %c2_62 = arith.constant 2 : index
    %c7_63 = arith.constant 7 : index
    %39 = memref.load %arg3[%c2_62, %c7_63] : memref<4x16xf32, #tpu.memory_space<smem>>
    %c2_64 = arith.constant 2 : index
    %c8_65 = arith.constant 8 : index
    %40 = memref.load %arg3[%c2_64, %c8_65] : memref<4x16xf32, #tpu.memory_space<smem>>
    %c2_66 = arith.constant 2 : index
    %c9_67 = arith.constant 9 : index
    %41 = memref.load %arg3[%c2_66, %c9_67] : memref<4x16xf32, #tpu.memory_space<smem>>
    %c2_68 = arith.constant 2 : index
    %c10_69 = arith.constant 10 : index
    %42 = memref.load %arg3[%c2_68, %c10_69] : memref<4x16xf32, #tpu.memory_space<smem>>
    %c2_70 = arith.constant 2 : index
    %c11_71 = arith.constant 11 : index
    %43 = memref.load %arg3[%c2_70, %c11_71] : memref<4x16xf32, #tpu.memory_space<smem>>
    %c2_72 = arith.constant 2 : index
    %c12_73 = arith.constant 12 : index
    %44 = memref.load %arg3[%c2_72, %c12_73] : memref<4x16xf32, #tpu.memory_space<smem>>
    %c2_74 = arith.constant 2 : index
    %c13_75 = arith.constant 13 : index
    %45 = memref.load %arg3[%c2_74, %c13_75] : memref<4x16xf32, #tpu.memory_space<smem>>
    %c2_76 = arith.constant 2 : index
    %c14_77 = arith.constant 14 : index
    %46 = memref.load %arg3[%c2_76, %c14_77] : memref<4x16xf32, #tpu.memory_space<smem>>
    %c2_78 = arith.constant 2 : index
    %c15_79 = arith.constant 15 : index
    %47 = memref.load %arg3[%c2_78, %c15_79] : memref<4x16xf32, #tpu.memory_space<smem>>
    %c3_80 = arith.constant 3 : index
    %c0_81 = arith.constant 0 : index
    %48 = memref.load %arg3[%c3_80, %c0_81] : memref<4x16xf32, #tpu.memory_space<smem>>
    %c3_82 = arith.constant 3 : index
    %c1_83 = arith.constant 1 : index
    %49 = memref.load %arg3[%c3_82, %c1_83] : memref<4x16xf32, #tpu.memory_space<smem>>
    %c3_84 = arith.constant 3 : index
    %c2_85 = arith.constant 2 : index
    %50 = memref.load %arg3[%c3_84, %c2_85] : memref<4x16xf32, #tpu.memory_space<smem>>
    %c3_86 = arith.constant 3 : index
    %c3_87 = arith.constant 3 : index
    %51 = memref.load %arg3[%c3_86, %c3_87] : memref<4x16xf32, #tpu.memory_space<smem>>
    %c3_88 = arith.constant 3 : index
    %c4_89 = arith.constant 4 : index
    %52 = memref.load %arg3[%c3_88, %c4_89] : memref<4x16xf32, #tpu.memory_space<smem>>
    %c3_90 = arith.constant 3 : index
    %c5_91 = arith.constant 5 : index
    %53 = memref.load %arg3[%c3_90, %c5_91] : memref<4x16xf32, #tpu.memory_space<smem>>
    %c3_92 = arith.constant 3 : index
    %c6_93 = arith.constant 6 : index
    %54 = memref.load %arg3[%c3_92, %c6_93] : memref<4x16xf32, #tpu.memory_space<smem>>
    %c3_94 = arith.constant 3 : index
    %c7_95 = arith.constant 7 : index
    %55 = memref.load %arg3[%c3_94, %c7_95] : memref<4x16xf32, #tpu.memory_space<smem>>
    %c3_96 = arith.constant 3 : index
    %c8_97 = arith.constant 8 : index
    %56 = memref.load %arg3[%c3_96, %c8_97] : memref<4x16xf32, #tpu.memory_space<smem>>
    %c3_98 = arith.constant 3 : index
    %c9_99 = arith.constant 9 : index
    %57 = memref.load %arg3[%c3_98, %c9_99] : memref<4x16xf32, #tpu.memory_space<smem>>
    %c3_100 = arith.constant 3 : index
    %c10_101 = arith.constant 10 : index
    %58 = memref.load %arg3[%c3_100, %c10_101] : memref<4x16xf32, #tpu.memory_space<smem>>
    %c3_102 = arith.constant 3 : index
    %c11_103 = arith.constant 11 : index
    %59 = memref.load %arg3[%c3_102, %c11_103] : memref<4x16xf32, #tpu.memory_space<smem>>
    %c3_104 = arith.constant 3 : index
    %c12_105 = arith.constant 12 : index
    %60 = memref.load %arg3[%c3_104, %c12_105] : memref<4x16xf32, #tpu.memory_space<smem>>
    %c3_106 = arith.constant 3 : index
    %c13_107 = arith.constant 13 : index
    %61 = memref.load %arg3[%c3_106, %c13_107] : memref<4x16xf32, #tpu.memory_space<smem>>
    %c3_108 = arith.constant 3 : index
    %c14_109 = arith.constant 14 : index
    %62 = memref.load %arg3[%c3_108, %c14_109] : memref<4x16xf32, #tpu.memory_space<smem>>
    %c3_110 = arith.constant 3 : index
    %c15_111 = arith.constant 15 : index
    %63 = memref.load %arg3[%c3_110, %c15_111] : memref<4x16xf32, #tpu.memory_space<smem>>
    %c0_112 = arith.constant 0 : index
    %c0_113 = arith.constant 0 : index
    %64 = memref.load %arg5[%c0_112, %c0_113] : memref<16x4xf32, #tpu.memory_space<smem>>
    %c0_114 = arith.constant 0 : index
    %c1_115 = arith.constant 1 : index
    %65 = memref.load %arg5[%c0_114, %c1_115] : memref<16x4xf32, #tpu.memory_space<smem>>
    %c0_116 = arith.constant 0 : index
    %c2_117 = arith.constant 2 : index
    %66 = memref.load %arg5[%c0_116, %c2_117] : memref<16x4xf32, #tpu.memory_space<smem>>
    %c0_118 = arith.constant 0 : index
    %c3_119 = arith.constant 3 : index
    %67 = memref.load %arg5[%c0_118, %c3_119] : memref<16x4xf32, #tpu.memory_space<smem>>
    %c1_120 = arith.constant 1 : index
    %c0_121 = arith.constant 0 : index
    %68 = memref.load %arg5[%c1_120, %c0_121] : memref<16x4xf32, #tpu.memory_space<smem>>
    %c1_122 = arith.constant 1 : index
    %c1_123 = arith.constant 1 : index
    %69 = memref.load %arg5[%c1_122, %c1_123] : memref<16x4xf32, #tpu.memory_space<smem>>
    %c1_124 = arith.constant 1 : index
    %c2_125 = arith.constant 2 : index
    %70 = memref.load %arg5[%c1_124, %c2_125] : memref<16x4xf32, #tpu.memory_space<smem>>
    %c1_126 = arith.constant 1 : index
    %c3_127 = arith.constant 3 : index
    %71 = memref.load %arg5[%c1_126, %c3_127] : memref<16x4xf32, #tpu.memory_space<smem>>
    %c2_128 = arith.constant 2 : index
    %c0_129 = arith.constant 0 : index
    %72 = memref.load %arg5[%c2_128, %c0_129] : memref<16x4xf32, #tpu.memory_space<smem>>
    %c2_130 = arith.constant 2 : index
    %c1_131 = arith.constant 1 : index
    %73 = memref.load %arg5[%c2_130, %c1_131] : memref<16x4xf32, #tpu.memory_space<smem>>
    %c2_132 = arith.constant 2 : index
    %c2_133 = arith.constant 2 : index
    %74 = memref.load %arg5[%c2_132, %c2_133] : memref<16x4xf32, #tpu.memory_space<smem>>
    %c2_134 = arith.constant 2 : index
    %c3_135 = arith.constant 3 : index
    %75 = memref.load %arg5[%c2_134, %c3_135] : memref<16x4xf32, #tpu.memory_space<smem>>
    %c3_136 = arith.constant 3 : index
    %c0_137 = arith.constant 0 : index
    %76 = memref.load %arg5[%c3_136, %c0_137] : memref<16x4xf32, #tpu.memory_space<smem>>
    %c3_138 = arith.constant 3 : index
    %c1_139 = arith.constant 1 : index
    %77 = memref.load %arg5[%c3_138, %c1_139] : memref<16x4xf32, #tpu.memory_space<smem>>
    %c3_140 = arith.constant 3 : index
    %c2_141 = arith.constant 2 : index
    %78 = memref.load %arg5[%c3_140, %c2_141] : memref<16x4xf32, #tpu.memory_space<smem>>
    %c3_142 = arith.constant 3 : index
    %c3_143 = arith.constant 3 : index
    %79 = memref.load %arg5[%c3_142, %c3_143] : memref<16x4xf32, #tpu.memory_space<smem>>
    %c4_144 = arith.constant 4 : index
    %c0_145 = arith.constant 0 : index
    %80 = memref.load %arg5[%c4_144, %c0_145] : memref<16x4xf32, #tpu.memory_space<smem>>
    %c4_146 = arith.constant 4 : index
    %c1_147 = arith.constant 1 : index
    %81 = memref.load %arg5[%c4_146, %c1_147] : memref<16x4xf32, #tpu.memory_space<smem>>
    %c4_148 = arith.constant 4 : index
    %c2_149 = arith.constant 2 : index
    %82 = memref.load %arg5[%c4_148, %c2_149] : memref<16x4xf32, #tpu.memory_space<smem>>
    %c4_150 = arith.constant 4 : index
    %c3_151 = arith.constant 3 : index
    %83 = memref.load %arg5[%c4_150, %c3_151] : memref<16x4xf32, #tpu.memory_space<smem>>
    %c5_152 = arith.constant 5 : index
    %c0_153 = arith.constant 0 : index
    %84 = memref.load %arg5[%c5_152, %c0_153] : memref<16x4xf32, #tpu.memory_space<smem>>
    %c5_154 = arith.constant 5 : index
    %c1_155 = arith.constant 1 : index
    %85 = memref.load %arg5[%c5_154, %c1_155] : memref<16x4xf32, #tpu.memory_space<smem>>
    %c5_156 = arith.constant 5 : index
    %c2_157 = arith.constant 2 : index
    %86 = memref.load %arg5[%c5_156, %c2_157] : memref<16x4xf32, #tpu.memory_space<smem>>
    %c5_158 = arith.constant 5 : index
    %c3_159 = arith.constant 3 : index
    %87 = memref.load %arg5[%c5_158, %c3_159] : memref<16x4xf32, #tpu.memory_space<smem>>
    %c6_160 = arith.constant 6 : index
    %c0_161 = arith.constant 0 : index
    %88 = memref.load %arg5[%c6_160, %c0_161] : memref<16x4xf32, #tpu.memory_space<smem>>
    %c6_162 = arith.constant 6 : index
    %c1_163 = arith.constant 1 : index
    %89 = memref.load %arg5[%c6_162, %c1_163] : memref<16x4xf32, #tpu.memory_space<smem>>
    %c6_164 = arith.constant 6 : index
    %c2_165 = arith.constant 2 : index
    %90 = memref.load %arg5[%c6_164, %c2_165] : memref<16x4xf32, #tpu.memory_space<smem>>
    %c6_166 = arith.constant 6 : index
    %c3_167 = arith.constant 3 : index
    %91 = memref.load %arg5[%c6_166, %c3_167] : memref<16x4xf32, #tpu.memory_space<smem>>
    %c7_168 = arith.constant 7 : index
    %c0_169 = arith.constant 0 : index
    %92 = memref.load %arg5[%c7_168, %c0_169] : memref<16x4xf32, #tpu.memory_space<smem>>
    %c7_170 = arith.constant 7 : index
    %c1_171 = arith.constant 1 : index
    %93 = memref.load %arg5[%c7_170, %c1_171] : memref<16x4xf32, #tpu.memory_space<smem>>
    %c7_172 = arith.constant 7 : index
    %c2_173 = arith.constant 2 : index
    %94 = memref.load %arg5[%c7_172, %c2_173] : memref<16x4xf32, #tpu.memory_space<smem>>
    %c7_174 = arith.constant 7 : index
    %c3_175 = arith.constant 3 : index
    %95 = memref.load %arg5[%c7_174, %c3_175] : memref<16x4xf32, #tpu.memory_space<smem>>
    %c8_176 = arith.constant 8 : index
    %c0_177 = arith.constant 0 : index
    %96 = memref.load %arg5[%c8_176, %c0_177] : memref<16x4xf32, #tpu.memory_space<smem>>
    %c8_178 = arith.constant 8 : index
    %c1_179 = arith.constant 1 : index
    %97 = memref.load %arg5[%c8_178, %c1_179] : memref<16x4xf32, #tpu.memory_space<smem>>
    %c8_180 = arith.constant 8 : index
    %c2_181 = arith.constant 2 : index
    %98 = memref.load %arg5[%c8_180, %c2_181] : memref<16x4xf32, #tpu.memory_space<smem>>
    %c8_182 = arith.constant 8 : index
    %c3_183 = arith.constant 3 : index
    %99 = memref.load %arg5[%c8_182, %c3_183] : memref<16x4xf32, #tpu.memory_space<smem>>
    %c9_184 = arith.constant 9 : index
    %c0_185 = arith.constant 0 : index
    %100 = memref.load %arg5[%c9_184, %c0_185] : memref<16x4xf32, #tpu.memory_space<smem>>
    %c9_186 = arith.constant 9 : index
    %c1_187 = arith.constant 1 : index
    %101 = memref.load %arg5[%c9_186, %c1_187] : memref<16x4xf32, #tpu.memory_space<smem>>
    %c9_188 = arith.constant 9 : index
    %c2_189 = arith.constant 2 : index
    %102 = memref.load %arg5[%c9_188, %c2_189] : memref<16x4xf32, #tpu.memory_space<smem>>
    %c9_190 = arith.constant 9 : index
    %c3_191 = arith.constant 3 : index
    %103 = memref.load %arg5[%c9_190, %c3_191] : memref<16x4xf32, #tpu.memory_space<smem>>
    %c10_192 = arith.constant 10 : index
    %c0_193 = arith.constant 0 : index
    %104 = memref.load %arg5[%c10_192, %c0_193] : memref<16x4xf32, #tpu.memory_space<smem>>
    %c10_194 = arith.constant 10 : index
    %c1_195 = arith.constant 1 : index
    %105 = memref.load %arg5[%c10_194, %c1_195] : memref<16x4xf32, #tpu.memory_space<smem>>
    %c10_196 = arith.constant 10 : index
    %c2_197 = arith.constant 2 : index
    %106 = memref.load %arg5[%c10_196, %c2_197] : memref<16x4xf32, #tpu.memory_space<smem>>
    %c10_198 = arith.constant 10 : index
    %c3_199 = arith.constant 3 : index
    %107 = memref.load %arg5[%c10_198, %c3_199] : memref<16x4xf32, #tpu.memory_space<smem>>
    %c11_200 = arith.constant 11 : index
    %c0_201 = arith.constant 0 : index
    %108 = memref.load %arg5[%c11_200, %c0_201] : memref<16x4xf32, #tpu.memory_space<smem>>
    %c11_202 = arith.constant 11 : index
    %c1_203 = arith.constant 1 : index
    %109 = memref.load %arg5[%c11_202, %c1_203] : memref<16x4xf32, #tpu.memory_space<smem>>
    %c11_204 = arith.constant 11 : index
    %c2_205 = arith.constant 2 : index
    %110 = memref.load %arg5[%c11_204, %c2_205] : memref<16x4xf32, #tpu.memory_space<smem>>
    %c11_206 = arith.constant 11 : index
    %c3_207 = arith.constant 3 : index
    %111 = memref.load %arg5[%c11_206, %c3_207] : memref<16x4xf32, #tpu.memory_space<smem>>
    %c12_208 = arith.constant 12 : index
    %c0_209 = arith.constant 0 : index
    %112 = memref.load %arg5[%c12_208, %c0_209] : memref<16x4xf32, #tpu.memory_space<smem>>
    %c12_210 = arith.constant 12 : index
    %c1_211 = arith.constant 1 : index
    %113 = memref.load %arg5[%c12_210, %c1_211] : memref<16x4xf32, #tpu.memory_space<smem>>
    %c12_212 = arith.constant 12 : index
    %c2_213 = arith.constant 2 : index
    %114 = memref.load %arg5[%c12_212, %c2_213] : memref<16x4xf32, #tpu.memory_space<smem>>
    %c12_214 = arith.constant 12 : index
    %c3_215 = arith.constant 3 : index
    %115 = memref.load %arg5[%c12_214, %c3_215] : memref<16x4xf32, #tpu.memory_space<smem>>
    %c13_216 = arith.constant 13 : index
    %c0_217 = arith.constant 0 : index
    %116 = memref.load %arg5[%c13_216, %c0_217] : memref<16x4xf32, #tpu.memory_space<smem>>
    %c13_218 = arith.constant 13 : index
    %c1_219 = arith.constant 1 : index
    %117 = memref.load %arg5[%c13_218, %c1_219] : memref<16x4xf32, #tpu.memory_space<smem>>
    %c13_220 = arith.constant 13 : index
    %c2_221 = arith.constant 2 : index
    %118 = memref.load %arg5[%c13_220, %c2_221] : memref<16x4xf32, #tpu.memory_space<smem>>
    %c13_222 = arith.constant 13 : index
    %c3_223 = arith.constant 3 : index
    %119 = memref.load %arg5[%c13_222, %c3_223] : memref<16x4xf32, #tpu.memory_space<smem>>
    %c14_224 = arith.constant 14 : index
    %c0_225 = arith.constant 0 : index
    %120 = memref.load %arg5[%c14_224, %c0_225] : memref<16x4xf32, #tpu.memory_space<smem>>
    %c14_226 = arith.constant 14 : index
    %c1_227 = arith.constant 1 : index
    %121 = memref.load %arg5[%c14_226, %c1_227] : memref<16x4xf32, #tpu.memory_space<smem>>
    %c14_228 = arith.constant 14 : index
    %c2_229 = arith.constant 2 : index
    %122 = memref.load %arg5[%c14_228, %c2_229] : memref<16x4xf32, #tpu.memory_space<smem>>
    %c14_230 = arith.constant 14 : index
    %c3_231 = arith.constant 3 : index
    %123 = memref.load %arg5[%c14_230, %c3_231] : memref<16x4xf32, #tpu.memory_space<smem>>
    %c15_232 = arith.constant 15 : index
    %c0_233 = arith.constant 0 : index
    %124 = memref.load %arg5[%c15_232, %c0_233] : memref<16x4xf32, #tpu.memory_space<smem>>
    %c15_234 = arith.constant 15 : index
    %c1_235 = arith.constant 1 : index
    %125 = memref.load %arg5[%c15_234, %c1_235] : memref<16x4xf32, #tpu.memory_space<smem>>
    %c15_236 = arith.constant 15 : index
    %c2_237 = arith.constant 2 : index
    %126 = memref.load %arg5[%c15_236, %c2_237] : memref<16x4xf32, #tpu.memory_space<smem>>
    %c15_238 = arith.constant 15 : index
    %c3_239 = arith.constant 3 : index
    %127 = memref.load %arg5[%c15_238, %c3_239] : memref<16x4xf32, #tpu.memory_space<smem>>
    %c0_240 = arith.constant 0 : index
    %128 = memref.load %arg4[%c0_240] : memref<16xf32, #tpu.memory_space<smem>>
    %129 = vector.broadcast %128 : f32 to vector<2x128xf32>
    %c1_241 = arith.constant 1 : index
    %130 = memref.load %arg4[%c1_241] : memref<16xf32, #tpu.memory_space<smem>>
    %131 = vector.broadcast %130 : f32 to vector<2x128xf32>
    %c2_242 = arith.constant 2 : index
    %132 = memref.load %arg4[%c2_242] : memref<16xf32, #tpu.memory_space<smem>>
    %133 = vector.broadcast %132 : f32 to vector<2x128xf32>
    %c3_243 = arith.constant 3 : index
    %134 = memref.load %arg4[%c3_243] : memref<16xf32, #tpu.memory_space<smem>>
    %135 = vector.broadcast %134 : f32 to vector<2x128xf32>
    %c4_244 = arith.constant 4 : index
    %136 = memref.load %arg4[%c4_244] : memref<16xf32, #tpu.memory_space<smem>>
    %137 = vector.broadcast %136 : f32 to vector<2x128xf32>
    %c5_245 = arith.constant 5 : index
    %138 = memref.load %arg4[%c5_245] : memref<16xf32, #tpu.memory_space<smem>>
    %139 = vector.broadcast %138 : f32 to vector<2x128xf32>
    %c6_246 = arith.constant 6 : index
    %140 = memref.load %arg4[%c6_246] : memref<16xf32, #tpu.memory_space<smem>>
    %141 = vector.broadcast %140 : f32 to vector<2x128xf32>
    %c7_247 = arith.constant 7 : index
    %142 = memref.load %arg4[%c7_247] : memref<16xf32, #tpu.memory_space<smem>>
    %143 = vector.broadcast %142 : f32 to vector<2x128xf32>
    %c8_248 = arith.constant 8 : index
    %144 = memref.load %arg4[%c8_248] : memref<16xf32, #tpu.memory_space<smem>>
    %145 = vector.broadcast %144 : f32 to vector<2x128xf32>
    %c9_249 = arith.constant 9 : index
    %146 = memref.load %arg4[%c9_249] : memref<16xf32, #tpu.memory_space<smem>>
    %147 = vector.broadcast %146 : f32 to vector<2x128xf32>
    %c10_250 = arith.constant 10 : index
    %148 = memref.load %arg4[%c10_250] : memref<16xf32, #tpu.memory_space<smem>>
    %149 = vector.broadcast %148 : f32 to vector<2x128xf32>
    %c11_251 = arith.constant 11 : index
    %150 = memref.load %arg4[%c11_251] : memref<16xf32, #tpu.memory_space<smem>>
    %151 = vector.broadcast %150 : f32 to vector<2x128xf32>
    %c12_252 = arith.constant 12 : index
    %152 = memref.load %arg4[%c12_252] : memref<16xf32, #tpu.memory_space<smem>>
    %153 = vector.broadcast %152 : f32 to vector<2x128xf32>
    %c13_253 = arith.constant 13 : index
    %154 = memref.load %arg4[%c13_253] : memref<16xf32, #tpu.memory_space<smem>>
    %155 = vector.broadcast %154 : f32 to vector<2x128xf32>
    %c14_254 = arith.constant 14 : index
    %156 = memref.load %arg4[%c14_254] : memref<16xf32, #tpu.memory_space<smem>>
    %157 = vector.broadcast %156 : f32 to vector<2x128xf32>
    %c15_255 = arith.constant 15 : index
    %158 = memref.load %arg4[%c15_255] : memref<16xf32, #tpu.memory_space<smem>>
    %159 = vector.broadcast %158 : f32 to vector<2x128xf32>
    %c0_256 = arith.constant 0 : index
    %160 = memref.load %arg6[%c0_256] : memref<4xf32, #tpu.memory_space<smem>>
    %161 = vector.broadcast %160 : f32 to vector<2x128xf32>
    %c1_257 = arith.constant 1 : index
    %162 = memref.load %arg6[%c1_257] : memref<4xf32, #tpu.memory_space<smem>>
    %163 = vector.broadcast %162 : f32 to vector<2x128xf32>
    %c2_258 = arith.constant 2 : index
    %164 = memref.load %arg6[%c2_258] : memref<4xf32, #tpu.memory_space<smem>>
    %165 = vector.broadcast %164 : f32 to vector<2x128xf32>
    %c3_259 = arith.constant 3 : index
    %166 = memref.load %arg6[%c3_259] : memref<4xf32, #tpu.memory_space<smem>>
    %167 = vector.broadcast %166 : f32 to vector<2x128xf32>
    %c0_i32 = arith.constant 0 : i32
    %c2_i32 = arith.constant 2 : i32
    %168 = arith.muli %c0_i32, %c2_i32 : i32
    %169 = tpu.assume_multiple %168, 2 : i32
    %c0_260 = arith.constant 0 : index
    %c0_261 = arith.constant 0 : index
    %170 = arith.index_cast %169 : i32 to index
    %c0_262 = arith.constant 0 : index
    %171 = vector.load %arg2[%c0_260, %c0_261, %170, %c0_262] : memref<1x4x2x128xf32, #tpu.memory_space<vmem>>, vector<1x1x2x128xf32>
    %172 = vector.shape_cast %171 : vector<1x1x2x128xf32> to vector<2x128xf32>
    %c0_263 = arith.constant 0 : index
    %c1_264 = arith.constant 1 : index
    %173 = arith.index_cast %169 : i32 to index
    %c0_265 = arith.constant 0 : index
    %174 = vector.load %arg2[%c0_263, %c1_264, %173, %c0_265] : memref<1x4x2x128xf32, #tpu.memory_space<vmem>>, vector<1x1x2x128xf32>
    %175 = vector.shape_cast %174 : vector<1x1x2x128xf32> to vector<2x128xf32>
    %c0_266 = arith.constant 0 : index
    %c2_267 = arith.constant 2 : index
    %176 = arith.index_cast %169 : i32 to index
    %c0_268 = arith.constant 0 : index
    %177 = vector.load %arg2[%c0_266, %c2_267, %176, %c0_268] : memref<1x4x2x128xf32, #tpu.memory_space<vmem>>, vector<1x1x2x128xf32>
    %178 = vector.shape_cast %177 : vector<1x1x2x128xf32> to vector<2x128xf32>
    %c0_269 = arith.constant 0 : index
    %c3_270 = arith.constant 3 : index
    %179 = arith.index_cast %169 : i32 to index
    %c0_271 = arith.constant 0 : index
    %180 = vector.load %arg2[%c0_269, %c3_270, %179, %c0_271] : memref<1x4x2x128xf32, #tpu.memory_space<vmem>>, vector<1x1x2x128xf32>
    %181 = vector.shape_cast %180 : vector<1x1x2x128xf32> to vector<2x128xf32>
    %182 = vector.broadcast %0 : f32 to vector<2x128xf32>
    %183 = arith.mulf %172, %182 : vector<2x128xf32>
    %184 = arith.addf %129, %183 : vector<2x128xf32>
    %185 = vector.broadcast %16 : f32 to vector<2x128xf32>
    %186 = arith.mulf %175, %185 : vector<2x128xf32>
    %187 = arith.addf %184, %186 : vector<2x128xf32>
    %188 = vector.broadcast %32 : f32 to vector<2x128xf32>
    %189 = arith.mulf %178, %188 : vector<2x128xf32>
    %190 = arith.addf %187, %189 : vector<2x128xf32>
    %191 = vector.broadcast %48 : f32 to vector<2x128xf32>
    %192 = arith.mulf %181, %191 : vector<2x128xf32>
    %193 = arith.addf %190, %192 : vector<2x128xf32>
    %cst = arith.constant 0.000000e+00 : f32
    %194 = vector.broadcast %cst : f32 to vector<2x128xf32>
    %195 = arith.maximumf %193, %194 : vector<2x128xf32>
    %196 = vector.broadcast %64 : f32 to vector<2x128xf32>
    %197 = arith.mulf %195, %196 : vector<2x128xf32>
    %198 = arith.addf %161, %197 : vector<2x128xf32>
    %199 = vector.broadcast %65 : f32 to vector<2x128xf32>
    %200 = arith.mulf %195, %199 : vector<2x128xf32>
    %201 = arith.addf %163, %200 : vector<2x128xf32>
    %202 = vector.broadcast %66 : f32 to vector<2x128xf32>
    %203 = arith.mulf %195, %202 : vector<2x128xf32>
    %204 = arith.addf %165, %203 : vector<2x128xf32>
    %205 = vector.broadcast %67 : f32 to vector<2x128xf32>
    %206 = arith.mulf %195, %205 : vector<2x128xf32>
    %207 = arith.addf %167, %206 : vector<2x128xf32>
    %208 = vector.broadcast %1 : f32 to vector<2x128xf32>
    %209 = arith.mulf %172, %208 : vector<2x128xf32>
    %210 = arith.addf %131, %209 : vector<2x128xf32>
    %211 = vector.broadcast %17 : f32 to vector<2x128xf32>
    %212 = arith.mulf %175, %211 : vector<2x128xf32>
    %213 = arith.addf %210, %212 : vector<2x128xf32>
    %214 = vector.broadcast %33 : f32 to vector<2x128xf32>
    %215 = arith.mulf %178, %214 : vector<2x128xf32>
    %216 = arith.addf %213, %215 : vector<2x128xf32>
    %217 = vector.broadcast %49 : f32 to vector<2x128xf32>
    %218 = arith.mulf %181, %217 : vector<2x128xf32>
    %219 = arith.addf %216, %218 : vector<2x128xf32>
    %cst_272 = arith.constant 0.000000e+00 : f32
    %220 = vector.broadcast %cst_272 : f32 to vector<2x128xf32>
    %221 = arith.maximumf %219, %220 : vector<2x128xf32>
    %222 = vector.broadcast %68 : f32 to vector<2x128xf32>
    %223 = arith.mulf %221, %222 : vector<2x128xf32>
    %224 = arith.addf %198, %223 : vector<2x128xf32>
    %225 = vector.broadcast %69 : f32 to vector<2x128xf32>
    %226 = arith.mulf %221, %225 : vector<2x128xf32>
    %227 = arith.addf %201, %226 : vector<2x128xf32>
    %228 = vector.broadcast %70 : f32 to vector<2x128xf32>
    %229 = arith.mulf %221, %228 : vector<2x128xf32>
    %230 = arith.addf %204, %229 : vector<2x128xf32>
    %231 = vector.broadcast %71 : f32 to vector<2x128xf32>
    %232 = arith.mulf %221, %231 : vector<2x128xf32>
    %233 = arith.addf %207, %232 : vector<2x128xf32>
    %234 = vector.broadcast %2 : f32 to vector<2x128xf32>
    %235 = arith.mulf %172, %234 : vector<2x128xf32>
    %236 = arith.addf %133, %235 : vector<2x128xf32>
    %237 = vector.broadcast %18 : f32 to vector<2x128xf32>
    %238 = arith.mulf %175, %237 : vector<2x128xf32>
    %239 = arith.addf %236, %238 : vector<2x128xf32>
    %240 = vector.broadcast %34 : f32 to vector<2x128xf32>
    %241 = arith.mulf %178, %240 : vector<2x128xf32>
    %242 = arith.addf %239, %241 : vector<2x128xf32>
    %243 = vector.broadcast %50 : f32 to vector<2x128xf32>
    %244 = arith.mulf %181, %243 : vector<2x128xf32>
    %245 = arith.addf %242, %244 : vector<2x128xf32>
    %cst_273 = arith.constant 0.000000e+00 : f32
    %246 = vector.broadcast %cst_273 : f32 to vector<2x128xf32>
    %247 = arith.maximumf %245, %246 : vector<2x128xf32>
    %248 = vector.broadcast %72 : f32 to vector<2x128xf32>
    %249 = arith.mulf %247, %248 : vector<2x128xf32>
    %250 = arith.addf %224, %249 : vector<2x128xf32>
    %251 = vector.broadcast %73 : f32 to vector<2x128xf32>
    %252 = arith.mulf %247, %251 : vector<2x128xf32>
    %253 = arith.addf %227, %252 : vector<2x128xf32>
    %254 = vector.broadcast %74 : f32 to vector<2x128xf32>
    %255 = arith.mulf %247, %254 : vector<2x128xf32>
    %256 = arith.addf %230, %255 : vector<2x128xf32>
    %257 = vector.broadcast %75 : f32 to vector<2x128xf32>
    %258 = arith.mulf %247, %257 : vector<2x128xf32>
    %259 = arith.addf %233, %258 : vector<2x128xf32>
    %260 = vector.broadcast %3 : f32 to vector<2x128xf32>
    %261 = arith.mulf %172, %260 : vector<2x128xf32>
    %262 = arith.addf %135, %261 : vector<2x128xf32>
    %263 = vector.broadcast %19 : f32 to vector<2x128xf32>
    %264 = arith.mulf %175, %263 : vector<2x128xf32>
    %265 = arith.addf %262, %264 : vector<2x128xf32>
    %266 = vector.broadcast %35 : f32 to vector<2x128xf32>
    %267 = arith.mulf %178, %266 : vector<2x128xf32>
    %268 = arith.addf %265, %267 : vector<2x128xf32>
    %269 = vector.broadcast %51 : f32 to vector<2x128xf32>
    %270 = arith.mulf %181, %269 : vector<2x128xf32>
    %271 = arith.addf %268, %270 : vector<2x128xf32>
    %cst_274 = arith.constant 0.000000e+00 : f32
    %272 = vector.broadcast %cst_274 : f32 to vector<2x128xf32>
    %273 = arith.maximumf %271, %272 : vector<2x128xf32>
    %274 = vector.broadcast %76 : f32 to vector<2x128xf32>
    %275 = arith.mulf %273, %274 : vector<2x128xf32>
    %276 = arith.addf %250, %275 : vector<2x128xf32>
    %277 = vector.broadcast %77 : f32 to vector<2x128xf32>
    %278 = arith.mulf %273, %277 : vector<2x128xf32>
    %279 = arith.addf %253, %278 : vector<2x128xf32>
    %280 = vector.broadcast %78 : f32 to vector<2x128xf32>
    %281 = arith.mulf %273, %280 : vector<2x128xf32>
    %282 = arith.addf %256, %281 : vector<2x128xf32>
    %283 = vector.broadcast %79 : f32 to vector<2x128xf32>
    %284 = arith.mulf %273, %283 : vector<2x128xf32>
    %285 = arith.addf %259, %284 : vector<2x128xf32>
    %286 = vector.broadcast %4 : f32 to vector<2x128xf32>
    %287 = arith.mulf %172, %286 : vector<2x128xf32>
    %288 = arith.addf %137, %287 : vector<2x128xf32>
    %289 = vector.broadcast %20 : f32 to vector<2x128xf32>
    %290 = arith.mulf %175, %289 : vector<2x128xf32>
    %291 = arith.addf %288, %290 : vector<2x128xf32>
    %292 = vector.broadcast %36 : f32 to vector<2x128xf32>
    %293 = arith.mulf %178, %292 : vector<2x128xf32>
    %294 = arith.addf %291, %293 : vector<2x128xf32>
    %295 = vector.broadcast %52 : f32 to vector<2x128xf32>
    %296 = arith.mulf %181, %295 : vector<2x128xf32>
    %297 = arith.addf %294, %296 : vector<2x128xf32>
    %cst_275 = arith.constant 0.000000e+00 : f32
    %298 = vector.broadcast %cst_275 : f32 to vector<2x128xf32>
    %299 = arith.maximumf %297, %298 : vector<2x128xf32>
    %300 = vector.broadcast %80 : f32 to vector<2x128xf32>
    %301 = arith.mulf %299, %300 : vector<2x128xf32>
    %302 = arith.addf %276, %301 : vector<2x128xf32>
    %303 = vector.broadcast %81 : f32 to vector<2x128xf32>
    %304 = arith.mulf %299, %303 : vector<2x128xf32>
    %305 = arith.addf %279, %304 : vector<2x128xf32>
    %306 = vector.broadcast %82 : f32 to vector<2x128xf32>
    %307 = arith.mulf %299, %306 : vector<2x128xf32>
    %308 = arith.addf %282, %307 : vector<2x128xf32>
    %309 = vector.broadcast %83 : f32 to vector<2x128xf32>
    %310 = arith.mulf %299, %309 : vector<2x128xf32>
    %311 = arith.addf %285, %310 : vector<2x128xf32>
    %312 = vector.broadcast %5 : f32 to vector<2x128xf32>
    %313 = arith.mulf %172, %312 : vector<2x128xf32>
    %314 = arith.addf %139, %313 : vector<2x128xf32>
    %315 = vector.broadcast %21 : f32 to vector<2x128xf32>
    %316 = arith.mulf %175, %315 : vector<2x128xf32>
    %317 = arith.addf %314, %316 : vector<2x128xf32>
    %318 = vector.broadcast %37 : f32 to vector<2x128xf32>
    %319 = arith.mulf %178, %318 : vector<2x128xf32>
    %320 = arith.addf %317, %319 : vector<2x128xf32>
    %321 = vector.broadcast %53 : f32 to vector<2x128xf32>
    %322 = arith.mulf %181, %321 : vector<2x128xf32>
    %323 = arith.addf %320, %322 : vector<2x128xf32>
    %cst_276 = arith.constant 0.000000e+00 : f32
    %324 = vector.broadcast %cst_276 : f32 to vector<2x128xf32>
    %325 = arith.maximumf %323, %324 : vector<2x128xf32>
    %326 = vector.broadcast %84 : f32 to vector<2x128xf32>
    %327 = arith.mulf %325, %326 : vector<2x128xf32>
    %328 = arith.addf %302, %327 : vector<2x128xf32>
    %329 = vector.broadcast %85 : f32 to vector<2x128xf32>
    %330 = arith.mulf %325, %329 : vector<2x128xf32>
    %331 = arith.addf %305, %330 : vector<2x128xf32>
    %332 = vector.broadcast %86 : f32 to vector<2x128xf32>
    %333 = arith.mulf %325, %332 : vector<2x128xf32>
    %334 = arith.addf %308, %333 : vector<2x128xf32>
    %335 = vector.broadcast %87 : f32 to vector<2x128xf32>
    %336 = arith.mulf %325, %335 : vector<2x128xf32>
    %337 = arith.addf %311, %336 : vector<2x128xf32>
    %338 = vector.broadcast %6 : f32 to vector<2x128xf32>
    %339 = arith.mulf %172, %338 : vector<2x128xf32>
    %340 = arith.addf %141, %339 : vector<2x128xf32>
    %341 = vector.broadcast %22 : f32 to vector<2x128xf32>
    %342 = arith.mulf %175, %341 : vector<2x128xf32>
    %343 = arith.addf %340, %342 : vector<2x128xf32>
    %344 = vector.broadcast %38 : f32 to vector<2x128xf32>
    %345 = arith.mulf %178, %344 : vector<2x128xf32>
    %346 = arith.addf %343, %345 : vector<2x128xf32>
    %347 = vector.broadcast %54 : f32 to vector<2x128xf32>
    %348 = arith.mulf %181, %347 : vector<2x128xf32>
    %349 = arith.addf %346, %348 : vector<2x128xf32>
    %cst_277 = arith.constant 0.000000e+00 : f32
    %350 = vector.broadcast %cst_277 : f32 to vector<2x128xf32>
    %351 = arith.maximumf %349, %350 : vector<2x128xf32>
    %352 = vector.broadcast %88 : f32 to vector<2x128xf32>
    %353 = arith.mulf %351, %352 : vector<2x128xf32>
    %354 = arith.addf %328, %353 : vector<2x128xf32>
    %355 = vector.broadcast %89 : f32 to vector<2x128xf32>
    %356 = arith.mulf %351, %355 : vector<2x128xf32>
    %357 = arith.addf %331, %356 : vector<2x128xf32>
    %358 = vector.broadcast %90 : f32 to vector<2x128xf32>
    %359 = arith.mulf %351, %358 : vector<2x128xf32>
    %360 = arith.addf %334, %359 : vector<2x128xf32>
    %361 = vector.broadcast %91 : f32 to vector<2x128xf32>
    %362 = arith.mulf %351, %361 : vector<2x128xf32>
    %363 = arith.addf %337, %362 : vector<2x128xf32>
    %364 = vector.broadcast %7 : f32 to vector<2x128xf32>
    %365 = arith.mulf %172, %364 : vector<2x128xf32>
    %366 = arith.addf %143, %365 : vector<2x128xf32>
    %367 = vector.broadcast %23 : f32 to vector<2x128xf32>
    %368 = arith.mulf %175, %367 : vector<2x128xf32>
    %369 = arith.addf %366, %368 : vector<2x128xf32>
    %370 = vector.broadcast %39 : f32 to vector<2x128xf32>
    %371 = arith.mulf %178, %370 : vector<2x128xf32>
    %372 = arith.addf %369, %371 : vector<2x128xf32>
    %373 = vector.broadcast %55 : f32 to vector<2x128xf32>
    %374 = arith.mulf %181, %373 : vector<2x128xf32>
    %375 = arith.addf %372, %374 : vector<2x128xf32>
    %cst_278 = arith.constant 0.000000e+00 : f32
    %376 = vector.broadcast %cst_278 : f32 to vector<2x128xf32>
    %377 = arith.maximumf %375, %376 : vector<2x128xf32>
    %378 = vector.broadcast %92 : f32 to vector<2x128xf32>
    %379 = arith.mulf %377, %378 : vector<2x128xf32>
    %380 = arith.addf %354, %379 : vector<2x128xf32>
    %381 = vector.broadcast %93 : f32 to vector<2x128xf32>
    %382 = arith.mulf %377, %381 : vector<2x128xf32>
    %383 = arith.addf %357, %382 : vector<2x128xf32>
    %384 = vector.broadcast %94 : f32 to vector<2x128xf32>
    %385 = arith.mulf %377, %384 : vector<2x128xf32>
    %386 = arith.addf %360, %385 : vector<2x128xf32>
    %387 = vector.broadcast %95 : f32 to vector<2x128xf32>
    %388 = arith.mulf %377, %387 : vector<2x128xf32>
    %389 = arith.addf %363, %388 : vector<2x128xf32>
    %390 = vector.broadcast %8 : f32 to vector<2x128xf32>
    %391 = arith.mulf %172, %390 : vector<2x128xf32>
    %392 = arith.addf %145, %391 : vector<2x128xf32>
    %393 = vector.broadcast %24 : f32 to vector<2x128xf32>
    %394 = arith.mulf %175, %393 : vector<2x128xf32>
    %395 = arith.addf %392, %394 : vector<2x128xf32>
    %396 = vector.broadcast %40 : f32 to vector<2x128xf32>
    %397 = arith.mulf %178, %396 : vector<2x128xf32>
    %398 = arith.addf %395, %397 : vector<2x128xf32>
    %399 = vector.broadcast %56 : f32 to vector<2x128xf32>
    %400 = arith.mulf %181, %399 : vector<2x128xf32>
    %401 = arith.addf %398, %400 : vector<2x128xf32>
    %cst_279 = arith.constant 0.000000e+00 : f32
    %402 = vector.broadcast %cst_279 : f32 to vector<2x128xf32>
    %403 = arith.maximumf %401, %402 : vector<2x128xf32>
    %404 = vector.broadcast %96 : f32 to vector<2x128xf32>
    %405 = arith.mulf %403, %404 : vector<2x128xf32>
    %406 = arith.addf %380, %405 : vector<2x128xf32>
    %407 = vector.broadcast %97 : f32 to vector<2x128xf32>
    %408 = arith.mulf %403, %407 : vector<2x128xf32>
    %409 = arith.addf %383, %408 : vector<2x128xf32>
    %410 = vector.broadcast %98 : f32 to vector<2x128xf32>
    %411 = arith.mulf %403, %410 : vector<2x128xf32>
    %412 = arith.addf %386, %411 : vector<2x128xf32>
    %413 = vector.broadcast %99 : f32 to vector<2x128xf32>
    %414 = arith.mulf %403, %413 : vector<2x128xf32>
    %415 = arith.addf %389, %414 : vector<2x128xf32>
    %416 = vector.broadcast %9 : f32 to vector<2x128xf32>
    %417 = arith.mulf %172, %416 : vector<2x128xf32>
    %418 = arith.addf %147, %417 : vector<2x128xf32>
    %419 = vector.broadcast %25 : f32 to vector<2x128xf32>
    %420 = arith.mulf %175, %419 : vector<2x128xf32>
    %421 = arith.addf %418, %420 : vector<2x128xf32>
    %422 = vector.broadcast %41 : f32 to vector<2x128xf32>
    %423 = arith.mulf %178, %422 : vector<2x128xf32>
    %424 = arith.addf %421, %423 : vector<2x128xf32>
    %425 = vector.broadcast %57 : f32 to vector<2x128xf32>
    %426 = arith.mulf %181, %425 : vector<2x128xf32>
    %427 = arith.addf %424, %426 : vector<2x128xf32>
    %cst_280 = arith.constant 0.000000e+00 : f32
    %428 = vector.broadcast %cst_280 : f32 to vector<2x128xf32>
    %429 = arith.maximumf %427, %428 : vector<2x128xf32>
    %430 = vector.broadcast %100 : f32 to vector<2x128xf32>
    %431 = arith.mulf %429, %430 : vector<2x128xf32>
    %432 = arith.addf %406, %431 : vector<2x128xf32>
    %433 = vector.broadcast %101 : f32 to vector<2x128xf32>
    %434 = arith.mulf %429, %433 : vector<2x128xf32>
    %435 = arith.addf %409, %434 : vector<2x128xf32>
    %436 = vector.broadcast %102 : f32 to vector<2x128xf32>
    %437 = arith.mulf %429, %436 : vector<2x128xf32>
    %438 = arith.addf %412, %437 : vector<2x128xf32>
    %439 = vector.broadcast %103 : f32 to vector<2x128xf32>
    %440 = arith.mulf %429, %439 : vector<2x128xf32>
    %441 = arith.addf %415, %440 : vector<2x128xf32>
    %442 = vector.broadcast %10 : f32 to vector<2x128xf32>
    %443 = arith.mulf %172, %442 : vector<2x128xf32>
    %444 = arith.addf %149, %443 : vector<2x128xf32>
    %445 = vector.broadcast %26 : f32 to vector<2x128xf32>
    %446 = arith.mulf %175, %445 : vector<2x128xf32>
    %447 = arith.addf %444, %446 : vector<2x128xf32>
    %448 = vector.broadcast %42 : f32 to vector<2x128xf32>
    %449 = arith.mulf %178, %448 : vector<2x128xf32>
    %450 = arith.addf %447, %449 : vector<2x128xf32>
    %451 = vector.broadcast %58 : f32 to vector<2x128xf32>
    %452 = arith.mulf %181, %451 : vector<2x128xf32>
    %453 = arith.addf %450, %452 : vector<2x128xf32>
    %cst_281 = arith.constant 0.000000e+00 : f32
    %454 = vector.broadcast %cst_281 : f32 to vector<2x128xf32>
    %455 = arith.maximumf %453, %454 : vector<2x128xf32>
    %456 = vector.broadcast %104 : f32 to vector<2x128xf32>
    %457 = arith.mulf %455, %456 : vector<2x128xf32>
    %458 = arith.addf %432, %457 : vector<2x128xf32>
    %459 = vector.broadcast %105 : f32 to vector<2x128xf32>
    %460 = arith.mulf %455, %459 : vector<2x128xf32>
    %461 = arith.addf %435, %460 : vector<2x128xf32>
    %462 = vector.broadcast %106 : f32 to vector<2x128xf32>
    %463 = arith.mulf %455, %462 : vector<2x128xf32>
    %464 = arith.addf %438, %463 : vector<2x128xf32>
    %465 = vector.broadcast %107 : f32 to vector<2x128xf32>
    %466 = arith.mulf %455, %465 : vector<2x128xf32>
    %467 = arith.addf %441, %466 : vector<2x128xf32>
    %468 = vector.broadcast %11 : f32 to vector<2x128xf32>
    %469 = arith.mulf %172, %468 : vector<2x128xf32>
    %470 = arith.addf %151, %469 : vector<2x128xf32>
    %471 = vector.broadcast %27 : f32 to vector<2x128xf32>
    %472 = arith.mulf %175, %471 : vector<2x128xf32>
    %473 = arith.addf %470, %472 : vector<2x128xf32>
    %474 = vector.broadcast %43 : f32 to vector<2x128xf32>
    %475 = arith.mulf %178, %474 : vector<2x128xf32>
    %476 = arith.addf %473, %475 : vector<2x128xf32>
    %477 = vector.broadcast %59 : f32 to vector<2x128xf32>
    %478 = arith.mulf %181, %477 : vector<2x128xf32>
    %479 = arith.addf %476, %478 : vector<2x128xf32>
    %cst_282 = arith.constant 0.000000e+00 : f32
    %480 = vector.broadcast %cst_282 : f32 to vector<2x128xf32>
    %481 = arith.maximumf %479, %480 : vector<2x128xf32>
    %482 = vector.broadcast %108 : f32 to vector<2x128xf32>
    %483 = arith.mulf %481, %482 : vector<2x128xf32>
    %484 = arith.addf %458, %483 : vector<2x128xf32>
    %485 = vector.broadcast %109 : f32 to vector<2x128xf32>
    %486 = arith.mulf %481, %485 : vector<2x128xf32>
    %487 = arith.addf %461, %486 : vector<2x128xf32>
    %488 = vector.broadcast %110 : f32 to vector<2x128xf32>
    %489 = arith.mulf %481, %488 : vector<2x128xf32>
    %490 = arith.addf %464, %489 : vector<2x128xf32>
    %491 = vector.broadcast %111 : f32 to vector<2x128xf32>
    %492 = arith.mulf %481, %491 : vector<2x128xf32>
    %493 = arith.addf %467, %492 : vector<2x128xf32>
    %494 = vector.broadcast %12 : f32 to vector<2x128xf32>
    %495 = arith.mulf %172, %494 : vector<2x128xf32>
    %496 = arith.addf %153, %495 : vector<2x128xf32>
    %497 = vector.broadcast %28 : f32 to vector<2x128xf32>
    %498 = arith.mulf %175, %497 : vector<2x128xf32>
    %499 = arith.addf %496, %498 : vector<2x128xf32>
    %500 = vector.broadcast %44 : f32 to vector<2x128xf32>
    %501 = arith.mulf %178, %500 : vector<2x128xf32>
    %502 = arith.addf %499, %501 : vector<2x128xf32>
    %503 = vector.broadcast %60 : f32 to vector<2x128xf32>
    %504 = arith.mulf %181, %503 : vector<2x128xf32>
    %505 = arith.addf %502, %504 : vector<2x128xf32>
    %cst_283 = arith.constant 0.000000e+00 : f32
    %506 = vector.broadcast %cst_283 : f32 to vector<2x128xf32>
    %507 = arith.maximumf %505, %506 : vector<2x128xf32>
    %508 = vector.broadcast %112 : f32 to vector<2x128xf32>
    %509 = arith.mulf %507, %508 : vector<2x128xf32>
    %510 = arith.addf %484, %509 : vector<2x128xf32>
    %511 = vector.broadcast %113 : f32 to vector<2x128xf32>
    %512 = arith.mulf %507, %511 : vector<2x128xf32>
    %513 = arith.addf %487, %512 : vector<2x128xf32>
    %514 = vector.broadcast %114 : f32 to vector<2x128xf32>
    %515 = arith.mulf %507, %514 : vector<2x128xf32>
    %516 = arith.addf %490, %515 : vector<2x128xf32>
    %517 = vector.broadcast %115 : f32 to vector<2x128xf32>
    %518 = arith.mulf %507, %517 : vector<2x128xf32>
    %519 = arith.addf %493, %518 : vector<2x128xf32>
    %520 = vector.broadcast %13 : f32 to vector<2x128xf32>
    %521 = arith.mulf %172, %520 : vector<2x128xf32>
    %522 = arith.addf %155, %521 : vector<2x128xf32>
    %523 = vector.broadcast %29 : f32 to vector<2x128xf32>
    %524 = arith.mulf %175, %523 : vector<2x128xf32>
    %525 = arith.addf %522, %524 : vector<2x128xf32>
    %526 = vector.broadcast %45 : f32 to vector<2x128xf32>
    %527 = arith.mulf %178, %526 : vector<2x128xf32>
    %528 = arith.addf %525, %527 : vector<2x128xf32>
    %529 = vector.broadcast %61 : f32 to vector<2x128xf32>
    %530 = arith.mulf %181, %529 : vector<2x128xf32>
    %531 = arith.addf %528, %530 : vector<2x128xf32>
    %cst_284 = arith.constant 0.000000e+00 : f32
    %532 = vector.broadcast %cst_284 : f32 to vector<2x128xf32>
    %533 = arith.maximumf %531, %532 : vector<2x128xf32>
    %534 = vector.broadcast %116 : f32 to vector<2x128xf32>
    %535 = arith.mulf %533, %534 : vector<2x128xf32>
    %536 = arith.addf %510, %535 : vector<2x128xf32>
    %537 = vector.broadcast %117 : f32 to vector<2x128xf32>
    %538 = arith.mulf %533, %537 : vector<2x128xf32>
    %539 = arith.addf %513, %538 : vector<2x128xf32>
    %540 = vector.broadcast %118 : f32 to vector<2x128xf32>
    %541 = arith.mulf %533, %540 : vector<2x128xf32>
    %542 = arith.addf %516, %541 : vector<2x128xf32>
    %543 = vector.broadcast %119 : f32 to vector<2x128xf32>
    %544 = arith.mulf %533, %543 : vector<2x128xf32>
    %545 = arith.addf %519, %544 : vector<2x128xf32>
    %546 = vector.broadcast %14 : f32 to vector<2x128xf32>
    %547 = arith.mulf %172, %546 : vector<2x128xf32>
    %548 = arith.addf %157, %547 : vector<2x128xf32>
    %549 = vector.broadcast %30 : f32 to vector<2x128xf32>
    %550 = arith.mulf %175, %549 : vector<2x128xf32>
    %551 = arith.addf %548, %550 : vector<2x128xf32>
    %552 = vector.broadcast %46 : f32 to vector<2x128xf32>
    %553 = arith.mulf %178, %552 : vector<2x128xf32>
    %554 = arith.addf %551, %553 : vector<2x128xf32>
    %555 = vector.broadcast %62 : f32 to vector<2x128xf32>
    %556 = arith.mulf %181, %555 : vector<2x128xf32>
    %557 = arith.addf %554, %556 : vector<2x128xf32>
    %cst_285 = arith.constant 0.000000e+00 : f32
    %558 = vector.broadcast %cst_285 : f32 to vector<2x128xf32>
    %559 = arith.maximumf %557, %558 : vector<2x128xf32>
    %560 = vector.broadcast %120 : f32 to vector<2x128xf32>
    %561 = arith.mulf %559, %560 : vector<2x128xf32>
    %562 = arith.addf %536, %561 : vector<2x128xf32>
    %563 = vector.broadcast %121 : f32 to vector<2x128xf32>
    %564 = arith.mulf %559, %563 : vector<2x128xf32>
    %565 = arith.addf %539, %564 : vector<2x128xf32>
    %566 = vector.broadcast %122 : f32 to vector<2x128xf32>
    %567 = arith.mulf %559, %566 : vector<2x128xf32>
    %568 = arith.addf %542, %567 : vector<2x128xf32>
    %569 = vector.broadcast %123 : f32 to vector<2x128xf32>
    %570 = arith.mulf %559, %569 : vector<2x128xf32>
    %571 = arith.addf %545, %570 : vector<2x128xf32>
    %572 = vector.broadcast %15 : f32 to vector<2x128xf32>
    %573 = arith.mulf %172, %572 : vector<2x128xf32>
    %574 = arith.addf %159, %573 : vector<2x128xf32>
    %575 = vector.broadcast %31 : f32 to vector<2x128xf32>
    %576 = arith.mulf %175, %575 : vector<2x128xf32>
    %577 = arith.addf %574, %576 : vector<2x128xf32>
    %578 = vector.broadcast %47 : f32 to vector<2x128xf32>
    %579 = arith.mulf %178, %578 : vector<2x128xf32>
    %580 = arith.addf %577, %579 : vector<2x128xf32>
    %581 = vector.broadcast %63 : f32 to vector<2x128xf32>
    %582 = arith.mulf %181, %581 : vector<2x128xf32>
    %583 = arith.addf %580, %582 : vector<2x128xf32>
    %cst_286 = arith.constant 0.000000e+00 : f32
    %584 = vector.broadcast %cst_286 : f32 to vector<2x128xf32>
    %585 = arith.maximumf %583, %584 : vector<2x128xf32>
    %586 = vector.broadcast %124 : f32 to vector<2x128xf32>
    %587 = arith.mulf %585, %586 : vector<2x128xf32>
    %588 = arith.addf %562, %587 : vector<2x128xf32>
    %589 = vector.broadcast %125 : f32 to vector<2x128xf32>
    %590 = arith.mulf %585, %589 : vector<2x128xf32>
    %591 = arith.addf %565, %590 : vector<2x128xf32>
    %592 = vector.broadcast %126 : f32 to vector<2x128xf32>
    %593 = arith.mulf %585, %592 : vector<2x128xf32>
    %594 = arith.addf %568, %593 : vector<2x128xf32>
    %595 = vector.broadcast %127 : f32 to vector<2x128xf32>
    %596 = arith.mulf %585, %595 : vector<2x128xf32>
    %597 = arith.addf %571, %596 : vector<2x128xf32>
    %c0_287 = arith.constant 0 : index
    %c0_288 = arith.constant 0 : index
    %598 = arith.index_cast %169 : i32 to index
    %c0_289 = arith.constant 0 : index
    %599 = vector.load %arg7[%c0_287, %c0_288, %598, %c0_289] : memref<1x4x2x128xf32, #tpu.memory_space<vmem>>, vector<1x1x2x128xf32>
    %600 = vector.shape_cast %599 : vector<1x1x2x128xf32> to vector<2x128xf32>
    %601 = vector.shape_cast %588 : vector<2x128xf32> to vector<1x1x2x128xf32>
    tpu.vector_store %arg7[%c0_287, %c0_288, %598, %c0_289], %601 {strides = array<i32>} : memref<1x4x2x128xf32, #tpu.memory_space<vmem>>, vector<1x1x2x128xf32>,
    %c0_290 = arith.constant 0 : index
    %c1_291 = arith.constant 1 : index
    %602 = arith.index_cast %169 : i32 to index
    %c0_292 = arith.constant 0 : index
    %603 = vector.load %arg7[%c0_290, %c1_291, %602, %c0_292] : memref<1x4x2x128xf32, #tpu.memory_space<vmem>>, vector<1x1x2x128xf32>
    %604 = vector.shape_cast %603 : vector<1x1x2x128xf32> to vector<2x128xf32>
    %605 = vector.shape_cast %591 : vector<2x128xf32> to vector<1x1x2x128xf32>
    tpu.vector_store %arg7[%c0_290, %c1_291, %602, %c0_292], %605 {strides = array<i32>} : memref<1x4x2x128xf32, #tpu.memory_space<vmem>>, vector<1x1x2x128xf32>,
    %c0_293 = arith.constant 0 : index
    %c2_294 = arith.constant 2 : index
    %606 = arith.index_cast %169 : i32 to index
    %c0_295 = arith.constant 0 : index
    %607 = vector.load %arg7[%c0_293, %c2_294, %606, %c0_295] : memref<1x4x2x128xf32, #tpu.memory_space<vmem>>, vector<1x1x2x128xf32>
    %608 = vector.shape_cast %607 : vector<1x1x2x128xf32> to vector<2x128xf32>
    %609 = vector.shape_cast %594 : vector<2x128xf32> to vector<1x1x2x128xf32>
    tpu.vector_store %arg7[%c0_293, %c2_294, %606, %c0_295], %609 {strides = array<i32>} : memref<1x4x2x128xf32, #tpu.memory_space<vmem>>, vector<1x1x2x128xf32>,
    %c0_296 = arith.constant 0 : index
    %c3_297 = arith.constant 3 : index
    %610 = arith.index_cast %169 : i32 to index
    %c0_298 = arith.constant 0 : index
    %611 = vector.load %arg7[%c0_296, %c3_297, %610, %c0_298] : memref<1x4x2x128xf32, #tpu.memory_space<vmem>>, vector<1x1x2x128xf32>
    %612 = vector.shape_cast %611 : vector<1x1x2x128xf32> to vector<2x128xf32>
    %613 = vector.shape_cast %597 : vector<2x128xf32> to vector<1x1x2x128xf32>
    tpu.vector_store %arg7[%c0_296, %c3_297, %610, %c0_298], %613 {strides = array<i32>} : memref<1x4x2x128xf32, #tpu.memory_space<vmem>>, vector<1x1x2x128xf32>,
    %c1_i32 = arith.constant 1 : i32
    return
  }
  func.func @transform_0(%arg0: i32, %arg1: i32) -> (i32, i32, i32, i32) {
    %c0_i32 = arith.constant 0 : i32
    %c0_i32_0 = arith.constant 0 : i32
    %c0_i32_1 = arith.constant 0 : i32
    return %arg0, %c0_i32, %arg1, %c0_i32_0 : i32, i32, i32, i32
  }
  func.func @transform_1(%arg0: i32, %arg1: i32) -> (i32, i32) {
    %c0_i32 = arith.constant 0 : i32
    %c0_i32_0 = arith.constant 0 : i32
    %c0_i32_1 = arith.constant 0 : i32
    return %c0_i32, %c0_i32_0 : i32, i32
  }
  func.func @transform_2(%arg0: i32, %arg1: i32) -> i32 {
    %c0_i32 = arith.constant 0 : i32
    %c0_i32_0 = arith.constant 0 : i32
    return %c0_i32 : i32
  }
  func.func @transform_3(%arg0: i32, %arg1: i32) -> (i32, i32) {
    %c0_i32 = arith.constant 0 : i32
    %c0_i32_0 = arith.constant 0 : i32
    %c0_i32_1 = arith.constant 0 : i32
    return %c0_i32, %c0_i32_0 : i32, i32
  }
  func.func @transform_4(%arg0: i32, %arg1: i32) -> i32 {
    %c0_i32 = arith.constant 0 : i32
    %c0_i32_0 = arith.constant 0 : i32
    return %c0_i32 : i32
  }
  func.func @transform_5(%arg0: i32, %arg1: i32) -> (i32, i32, i32, i32) {
    %c0_i32 = arith.constant 0 : i32
    %c0_i32_0 = arith.constant 0 : i32
    %c0_i32_1 = arith.constant 0 : i32
    return %arg0, %c0_i32, %arg1, %c0_i32_0 : i32, i32, i32, i32
  }
}

</mosaic_0001>

<bundles_post_ra>
// kernel: tpu_custom_call.1
= control target key start
LH: loop header
LB: loop body
LE: loop exit
PB: predicated region body
PF: predicated region fallthrough
CT: control target
= control target key end

     0   :  { %s2493_s0 = inlined_call_operand.vmem [shape: f32[2,4,2,128], index: 0, kind: input, shape index: {}]   ;;  %s2494_s1 = inlined_call_operand.vmem [shape: f32[4,16], index: 1, kind: input, shape index: {}]   ;;  %s2495_s2 = inlined_call_operand.vmem [shape: f32[16], index: 2, kind: input, shape index: {}]   ;;  %s2496_s3 = inlined_call_operand.vmem [shape: f32[16,4], index: 3, kind: input, shape index: {}]   ;;  %s2497_s4 = inlined_call_operand.vmem [shape: f32[4], index: 4, kind: input, shape index: {}]   ;;  %s2498_s5 = inlined_call_operand.hbm [shape: f32[2,4,2,128], index: 5, kind: output, shape index: {}]  }
   0x1   :  { %2561 = sst [smem:[#allocation84_spill]] %s2493_s0 }
   0x2   :  { %2562 = sst [smem:[#allocation85_spill]] %s2494_s1 }
   0x3   :  { %2563 = sst [smem:[#allocation86_spill]] %s2495_s2 }
   0x4   :  { %2564 = sst [smem:[#allocation87_spill]] %s2496_s3 }
   0x5   :  { %2565 = sst [smem:[#allocation88_spill]] %s2497_s4 }
   0x6   :  { %2566 = sst [smem:[#allocation89_spill]] %s2498_s5 }
   0x7   :  { %10 = vsyncpa [#allocation4], 0 }
   0x8   :  { %11 = vsyncpa [#allocation6], 0 }
   0x9   :  { %12 = vsyncpa [#allocation9], 0 }
   0xa   :  { %13 = vsyncpa [#allocation3], 0 }
   0xb   :  { %15 = vsyncpa [#allocation3 + $0x1], 0  ;;  %s1491_s18 = smov 0   ;;  %s1493_s19 = smov 0  }
   0xc   :  { %s1495_s20 = smov 0   ;;  %s1497_s21 = smov 0  }
   0xd   :  { %s1499_s22 = smov 0   ;;  %s1501_s23 = smov 0  }
   0xe LB: > { %2567 = sst [smem:[#allocation15_spill]] %s1430_s18  ;;  %s1027_s24 = sadd.s32 4294967295, %s1450_s23   ;;  %s1450_s23 = sphi %s1501_s23, %s21_s23   ;;  %s1446_s22 = sphi %s1499_s22, %s2851_s22   ;;  %s1442_s21 = sphi %s1497_s21, %s2850_s21   ;;  %s1438_s20 = sphi %s1495_s20, %s2849_s20   ;;  %s1434_s19 = sphi %s1493_s19, %s2848_s19   ;;  %s1430_s18 = sphi %s1491_s18, %s2847_s18  }
   0xf   : > { %2568 = sst [smem:[#allocation16_spill]] %s1434_s19  ;;  %s1028_s25 = sadd.s32 4294967294, %s1450_s23  }
  0x10   : > { %2569 = sst [smem:[#allocation17_spill]] %s1438_s20  ;;  %s33_s26 = sadd.s32 1, %s1446_s22 }
  0x11   : > { %2570 = sst [smem:[#allocation18_spill]] %s1442_s21  ;;  %s154_s27 = sadd.s32 1, %s1438_s20 }
  0x12   : > { %2571 = sst [smem:[#allocation19_spill]] %s1446_s22  ;;  %p35_p0 = scmp.ge.s32.totalorder %s33_s26, 2 }
  0x13   : > { %2572 = sst [smem:[#allocation20_spill]] %s1450_s23  ;;  %p164_p1 = scmp.ne.s32.totalorder %s1438_s20, %s1434_s19 }
  0x14   : > { %p165_p2 = scmp.eq.s32.totalorder %s1027_s24, 1  ;;  %p170_p3 = scmp.ne.s32.totalorder %s1434_s19, %s1430_s18 }
  0x15   : > { %s2853_s26 = smov (%p35_p0, %s33_s26), 0  ;;  %p171_p5 = scmp.eq.s32.totalorder %s1028_s25, 1 }
  0x16   : > { %2573 = sst [smem:[#allocation21_spill]] %s2853_s26  ;;  %p1531_p4 = por %p165_p2, %p164_p1 }
  0x17   : > { %s149_s29 = ssub.s32 %s1446_s22, %s2853_s26  ;;  %p1029_p6 = scmp.ge.s32.totalorder %s1450_s23, 1 }
  0x18   : > { %s2574_s28 = scalar_select %p1531_p4, 1, 0 }
  0x19   : > { %p152_p7 = scmp.eq.s32.totalorder %s149_s29, 0  ;;  %p1538_p8 = por %p171_p5, %p170_p3 }
  0x1a   : > { %2575 = sst [smem:[#allocation22_spill]] %s2574_s28  ;;  %p178_p9 = scmp.lt.s32.totalorder %s1450_s23, 3 }
  0x1b   : > { %s2576_s30 = scalar_select %p1538_p8, 1, 0 }
  0x1c   : > { %s1544_s6 = scalar_select %p152_p7, %s1438_s20, %s154_s27  }
  0x1d   : > { %2577 = sst [smem:[#allocation23_spill]] %s2576_s30  ;;  %p1546_p10 = pnand %p1029_p6, %p178_p9 }
  0x1e   : > { %2578 = sst [smem:[#allocation24_spill]] %s1544_s6  ;;  %p1550_p11 = scmp.eq.s32.totalorder %s1027_s24, 0 }
  0x1f   : > { %s2579_s7 = scalar_select %p1546_p10, 1, 0 }
  0x20   : > { %s2580_s8 = scalar_select %p1550_p11, 1, 0 }
  0x21   : > { %s2581_s2 = sld [smem:[#allocation86_spill]]  ;;  %p1218_p12 = pneg %p1546_p10 }
  0x22   : > { %s2582_s1 = sld [smem:[#allocation85_spill]]  ;;  %s2584_s3 = sld [smem:[#allocation87_spill]] }
  0x23   : > { %p1564_p13 = pnand %p1550_p11, %p1218_p12 }
  0x25   : > { %p1302_p1 = pneg %p1564_p13 }
  0x27   : > { %s202_s11 = sshll.u32 %s2581_s2, 4  ;;  %s203_s11 = int_to_ptr.vmem [resolvable:$true] %s202_s11 }
  0x28   : > { %s191_s14 = sshll.u32 %s2582_s1, 4  ;;  %s212_s24 = sshll.u32 %s2584_s3, 4  ;;  %s192_s14 = int_to_ptr.vmem [resolvable:$true] %s191_s14  ;;  %s213_s24 = int_to_ptr.vmem [resolvable:$true] %s212_s24 }
  0x29   : > { %s1300_s25 = scalar_lea.vmem %s203_s11, 16  ;;  %p1308_p5 = scmp.lt.s32.totalorder %s203_s11, %s203_s11 }
  0x2a   : > { %p1301_p0 = scmp.ne.s32.totalorder %s203_s11, %s1300_s25  ;;  %p1309_p6 = scmp.lt.s32.totalorder %s1300_s25, %s1300_s25 }
  0x2c   : > { %p1303_p2 = pnand %p1302_p1, %p1301_p0  ;;  %p1310_p7 = por %p1309_p6, %p1308_p5 }
  0x2e   : > { %p1304_p3 = pneg %p1303_p2 }
  0x30   : > { %p1311_p9 = pnand %p1310_p7, %p1304_p3 }
  0x32   : > { %1314 = shalt.err (!%p1311_p9)
}
  0x33   : > { %s1452_s27 = smov [#allocation5]   ;;  %s1315_s29 = scalar_lea.vmem %s192_s14, 64 }
  0x34   : > { %1224 = dma.vmem_to_smem (!%p1564_p13), %s203_s11, 16, %s1452_s27, [#allocation6]  }
  0x35   : > { %p1316_p12 = scmp.ne.s32.totalorder %s192_s14, %s1315_s29  ;;  %p1323_p11 = scmp.lt.s32.totalorder %s192_s14, %s192_s14 }
  0x36   : > { %p1324_p10 = scmp.lt.s32.totalorder %s1315_s29, %s1315_s29 }
  0x37   : > { %p1318_p8 = pnand %p1316_p12, %p1302_p1 }
  0x38   : > { %p1325_p0 = por %p1324_p10, %p1323_p11 }
  0x39   : > { %p1319_p4 = pneg %p1318_p8 }
  0x3b   : > { %p1326_p2 = pnand %p1325_p0, %p1319_p4 }
  0x3d   : > { %1329 = shalt.err (!%p1326_p2)
}
  0x3e   : > { %s1453_s9 = smov [#allocation2]   ;;  %s1330_s10 = scalar_lea.vmem %s213_s24, 256 }
  0x3f   : > { %1221 = dma.vmem_to_smem (!%p1564_p13), %s192_s14, 64, %s1453_s9, [#allocation4]  }
  0x40   : > { %p1331_p3 = scmp.ne.s32.totalorder %s213_s24, %s1330_s10  ;;  %p1338_p7 = scmp.lt.s32.totalorder %s213_s24, %s213_s24 }
  0x41   : > { %p1339_p9 = scmp.lt.s32.totalorder %s1330_s10, %s1330_s10 }
  0x42   : > { %p1333_p5 = pnand %p1331_p3, %p1302_p1 }
  0x43   : > { %p1340_p8 = por %p1339_p9, %p1338_p7 }
  0x44   : > { %p1334_p6 = pneg %p1333_p5 }
  0x46   : > { %p1341_p12 = pnand %p1340_p8, %p1334_p6 }
  0x48   : > { %1344 = shalt.err (!%p1341_p12)
}
  0x49   : > { %s1454_s11 = smov [#allocation7]   ;;  %s1455_s12 = smov 128  }
  0x4a   : > { %s1456_s13 = smov 8   ;;  %s2585_s4 = sld [smem:[#allocation88_spill]] }
  0x4b   : > { %1227 = dma.vmem_to_smem (!%p1564_p13), %s213_s24, 256, %s1454_s11, [#allocation6], %s1455_s12, %s1455_s12, %s1456_s13  }
  0x50   : > { %s226_s17 = sshll.u32 %s2585_s4, 4  ;;  %s227_s17 = int_to_ptr.vmem [resolvable:$true] %s226_s17 }
  0x51   : > { %s1345_s25 = scalar_lea.vmem %s227_s17, 16  ;;  %p1353_p0 = scmp.lt.s32.totalorder %s227_s17, %s227_s17 }
  0x52   : > { %p1346_p4 = scmp.ne.s32.totalorder %s227_s17, %s1345_s25  ;;  %p1354_p2 = scmp.lt.s32.totalorder %s1345_s25, %s1345_s25 }
  0x54   : > { %p1348_p10 = pnand %p1346_p4, %p1302_p1  ;;  %p1355_p3 = por %p1354_p2, %p1353_p0 }
  0x56   : > { %p1349_p11 = pneg %p1348_p10 }
  0x58   : > { %p1356_p5 = pnand %p1355_p3, %p1349_p11 }
  0x5a   : > { %1359 = shalt.err (!%p1356_p5)
}
  0x5b   : > { %s1457_s27 = smov [#allocation8]   ;;  %p2586_p6 = scmp.ne.s32.totalorder %s2579_s7, 0 }
  0x5c   : > { %1230 = dma.vmem_to_smem (!%p1564_p13), %s227_s17, 16, %s1457_s27, [#allocation9]  }
  0x5d   : > { %250 = sbr.rel (%p2586_p6) target bundleno = 315 (0x13b), region = 40 }
  0x64   : > { %p2587_p7 = scmp.ne.s32.totalorder %s2580_s8, 0 }
  0x66   : > { %1413 = dma.done.wait (%p2587_p7), [#allocation4], 64  }
  0x67   : > { %1415 = vsyncadd (%p2587_p7), [#allocation4], 4294967232 }
  0x68   : > { %1417 = dma.done.wait (%p2587_p7), [#allocation6], 272  }
  0x69   : > { %1419 = vsyncadd (%p2587_p7), [#allocation6], 4294967024 }
  0x6a   : > { %1421 = dma.done.wait (%p2587_p7), [#allocation9], 16  }
  0x6b   : > { %1423 = vsyncadd (%p2587_p7), [#allocation9], 4294967280 }
  0x6c   : > { %268 = sfence }
  0x6d   : > { %p294_p13 = scmp.lt.s32.totalorder %s1442_s21, 1  ;;  %s1612_s24 = sld [smem:[#allocation2]] }
  0x6e   : > { %s1614_s29 = sld [smem:[#allocation2 + $0x1]]  ;;  %s1616_s9 = sld [smem:[#allocation2 + $0x2]] }
  0x6f   : > { %s295_s7 = scalar_select %p294_p13, %s1442_s21, 1 }
  0x70   : > { %s1618_s10 = sld [smem:[#allocation2 + $0x3]]  ;;  %s1620_s11 = sld [smem:[#allocation2 + $0x4]] }
  0x71   : > { %s1198_s15 = sshll.u32 %s295_s7, 3  ;;  %s2588_s0 = sld [smem:[#allocation84_spill]] }
  0x72   : > { %s1627_s14 = sld [smem:[#allocation2 + $0x5]]  ;;  %s1629_s16 = sld [smem:[#allocation2 + $0x6]] }
  0x73   : > { %s1631_s17 = sld [smem:[#allocation2 + $0x7]]  ;;  %s1633_s25 = sld [smem:[#allocation2 + $0x8]]  ;;  %v480_v1 = vstv %s1612_s24 }
  0x74   : > { %s1635_s27 = sld [smem:[#allocation2 + $0x9]]  ;;  %s1637_s7 = sld [smem:[#allocation2 + $0xa]]  ;;  %v505_v2 = vstv %s1614_s29  ;;  %v530_v3 = vstv %s1616_s9 }
  0x75   : > { %s1639_s1 = sld [smem:[#allocation2 + $0xb]]  ;;  %s1641_s2 = sld [smem:[#allocation2 + $0xc]] }
  0x76   : > { %s1643_s3 = sld [smem:[#allocation2 + $0xd]]  ;;  %s1647_s12 = sld [smem:[#allocation2 + $0xf]]  ;;  %v555_v4 = vstv %s1618_s10  ;;  %v580_v7 = vstv %s1620_s11 }
  0x77   : > { %s1625_s8 = scalar_lea.vmem %s2588_s0, %s1198_s15  ;;  %s1645_s15 = sld [smem:[#allocation2 + $0xe]] }
  0x78   : > { %s1649_s13 = sld [smem:[#allocation2 + $0x80]]  ;;  %s1651_s0 = sld [smem:[#allocation2 + $0x81]]  ;;  %v470_v0 = vld [vmem:[%s1625_s8] sm:$0x3]  ;;  %v605_v8 = vstv %s1627_s14  ;;  %v630_v11 = vstv %s1629_s16  ;;  %v1771_v29 = vld [vmem:[%s1625_s8 + $0x2] sm:$0x3] }
  0x79   : > { %s1653_s4 = sld [smem:[#allocation2 + $0x82]]  ;;  %s1655_s26 = sld [smem:[#allocation2 + $0x83]]  ;;  %v1710_v5 = vmul.f32 %v480_v1, %v470_v0  ;;  %v1712_v6 = vmul.f32 %v505_v2, %v470_v0  ;;  %v1720_v9 = vmul.f32 %v530_v3, %v470_v0  ;;  %v1722_v10 = vmul.f32 %v555_v4, %v470_v0  ;;  %v1854_v58 = vld [vmem:[%s1625_s8 + $0x4] sm:$0x3] }
  0x7a   : > { %s1657_s22 = sld [smem:[#allocation2 + $0x84]]  ;;  %s1659_s6 = sld [smem:[#allocation2 + $0x85]]  ;;  %v655_v12 = vstv %s1631_s17  ;;  %v680_v13 = vstv %s1633_s25  ;;  %v705_v14 = vstv %s1635_s27  ;;  %v730_v15 = vstv %s1637_s7 }
  0x7b   : > { %s1661_s20 = sld [smem:[#allocation2 + $0x86]]  ;;  %s1663_s30 = sld [smem:[#allocation2 + $0x87]]  ;;  %v755_v16 = vstv %s1639_s1  ;;  %v1738_v17 = vmul.f32 %v580_v7, %v470_v0  ;;  %v1740_v18 = vmul.f32 %v605_v8, %v470_v0  ;;  %v780_v19 = vstv %s1641_s2 }
  0x7c   : > { %s1665_s18 = sld [smem:[#allocation2 + $0x88]]  ;;  %s1667_s23 = sld [smem:[#allocation2 + $0x89]]  ;;  %v805_v20 = vstv %s1643_s3  ;;  %v1748_v21 = vmul.f32 %v630_v11, %v470_v0  ;;  %v1750_v22 = vmul.f32 %v655_v12, %v470_v0  ;;  %v855_v24 = vstv %s1647_s12 }
  0x7d   : > { %s1669_s5 = sld [smem:[#allocation2 + $0x8a]]  ;;  %s1671_s28 = sld [smem:[#allocation2 + $0x8b]]  ;;  %v830_v23 = vstv %s1645_s15  ;;  %v1758_v25 = vmul.f32 %v680_v13, %v470_v0  ;;  %v1760_v26 = vmul.f32 %v705_v14, %v470_v0  ;;  %v1762_v27 = vmul.f32 %v730_v15, %v470_v0 }
  0x7e   : > { %s1673_s21 = sld [smem:[#allocation2 + $0x8c]]  ;;  %s1675_s19 = sld [smem:[#allocation2 + $0x8d]]  ;;  %v1764_v28 = vmul.f32 %v755_v16, %v470_v0  ;;  %v483_v30 = vstv %s1649_s13  ;;  %v508_v31 = vstv %s1651_s0  ;;  %v1775_v32 = vmul.f32 %v780_v19, %v470_v0 }
  0x7f   : > { %s1716_s24 = sld [smem:[#allocation2 + $0x10c]]  ;;  %s1718_s29 = sld [smem:[#allocation2 + $0x10d]]  ;;  %v1777_v33 = vmul.f32 %v805_v20, %v470_v0  ;;  %v533_v34 = vstv %s1653_s4  ;;  %v558_v35 = vstv %s1655_s26  ;;  %v1785_v36 = vmul.f32 %v830_v23, %v470_v0 }
  0x80   : > { %2589 = sst [smem:[#allocation25_spill]] %s1657_s22  ;;  %s1726_s9 = sld [smem:[#allocation2 + $0x10e]]  ;;  %2612 = vst [vmem:[#allocation43_spill] sm:$0xff] %v1775_v32  ;;  %v1787_v37 = vmul.f32 %v855_v24, %v470_v0  ;;  %v1802_v42 = vmul.f32 %v1771_v29, %v483_v30  ;;  %v1805_v43 = vmul.f32 %v1771_v29, %v508_v31  ;;  %v1814_v46 = vmul.f32 %v1771_v29, %v533_v34 }
  0x81   : > { %2590 = sst [smem:[#allocation26_spill]] %s1659_s6  ;;  %s1679_s6 = sld [smem:[#allocation2 + $0x8f]]  ;;  %2613 = vst [vmem:[#allocation44_spill] sm:$0xff] %v1777_v33  ;;  %2618 = vst [vmem:[#allocation45_spill] sm:$0xff] %v1785_v36  ;;  %v1817_v47 = vmul.f32 %v1771_v29, %v558_v35 }
  0x82   : > { %2591 = sst [smem:[#allocation27_spill]] %s1661_s20  ;;  %s1677_s20 = sld [smem:[#allocation2 + $0x8e]]  ;;  %2619 = vst [vmem:[#allocation46_spill] sm:$0xff] %v1787_v37 }
  0x83   : > { %2592 = sst [smem:[#allocation28_spill]] %s1663_s30  ;;  %s1681_s30 = sld [smem:[#allocation2 + $0x100]]  ;;  %v733_v48 = vstv %s1669_s5 }
  0x84   : > { %2593 = sst [smem:[#allocation29_spill]] %s1665_s18  ;;  %s1683_s18 = sld [smem:[#allocation2 + $0x101]]  ;;  %v808_v57 = vstv %s1675_s19  ;;  %v1857_v59 = vmul.f32 %v1771_v29, %v733_v48 }
  0x85   : > { %2594 = sst [smem:[#allocation30_spill]] %s1667_s23  ;;  %s1685_s22 = sld [smem:[#allocation2 + $0x102]]  ;;  %v1882_v8 = vmul.f32 %v1771_v29, %v808_v57 }
  0x86   : > { %2595 = sst [smem:[#allocation31_spill]] %s1671_s28  ;;  %s1687_s23 = sld [smem:[#allocation2 + $0x103]] }
  0x87   : > { %2596 = sst [smem:[#allocation32_spill]] %s1673_s21  ;;  %s1689_s28 = sld [smem:[#allocation2 + $0x104]]  ;;  %2642 = vst [vmem:[#allocation50_spill] sm:$0xff] %v1882_v8 }
  0x88   : > { %2597 = sst [smem:[#allocation33_spill]] %s1677_s20  ;;  %s1691_s21 = sld [smem:[#allocation2 + $0x105]] }
  0x89   : > { %2598 = sst [smem:[#allocation34_spill]] %s1679_s6  ;;  %s1696_s20 = sld [smem:[#allocation2 + $0x106]]  ;;  %v486_v63 = vstv %s1681_s30 }
  0x8a   : > { %s1698_s6 = sld [smem:[#allocation2 + $0x107]]  ;;  %s1734_s11 = sld [smem:[#allocation2 + $0x180]]  ;;  %v511_v0 = vstv %s1683_s18  ;;  %v1901_v15 = vmul.f32 %v1854_v58, %v486_v63 }
  0x8b   : > { %2599 = sst [smem:[#allocation35_spill]] %s1685_s22  ;;  %s1702_s22 = sld [smem:[#allocation2 + $0x108]]  ;;  %v1904_v16 = vmul.f32 %v1854_v58, %v511_v0 }
  0x8c   : > { %2600 = sst [smem:[#allocation36_spill]] %s1687_s23  ;;  %s1704_s23 = sld [smem:[#allocation2 + $0x109]] }
  0x8d   : > { %2601 = sst [smem:[#allocation37_spill]] %s1689_s28  ;;  %s1706_s28 = sld [smem:[#allocation2 + $0x10a]] }
  0x8e   : > { %2602 = sst [smem:[#allocation38_spill]] %s1691_s21  ;;  %s1708_s21 = sld [smem:[#allocation2 + $0x10b]] }
  0x8f   : > { %s1728_s10 = sld [smem:[#allocation2 + $0x10f]]  ;;  %s1736_s14 = sld [smem:[#allocation2 + $0x181]]  ;;  %v636_v11 = vstv %s1696_s20 }
  0x90   : > { %s1744_s16 = sld [smem:[#allocation2 + $0x182]]  ;;  %s1746_s17 = sld [smem:[#allocation2 + $0x183]]  ;;  %v661_v12 = vstv %s1698_s6  ;;  %v1929_v31 = vmul.f32 %v1854_v58, %v636_v11  ;;  %v489_v48 = vstv %s1734_s11 }
  0x91   : > { %s1754_s1 = sld [smem:[#allocation2 + $0x184]]  ;;  %s1756_s25 = sld [smem:[#allocation2 + $0x185]]  ;;  %v1932_v34 = vmul.f32 %v1854_v58, %v661_v12 }
  0x92   : > { %s2607_s2 = sld [smem:[#allocation25_spill]]  ;;  %s1766_s3 = sld [smem:[#allocation2 + $0x186]]  ;;  %v711_v30 = vstv %s1704_s23 }
  0x93   : > { %s2608_s27 = sld [smem:[#allocation26_spill]]  ;;  %s1768_s7 = sld [smem:[#allocation2 + $0x187]]  ;;  %v736_v35 = vstv %s1706_s28  ;;  %v1957_v57 = vmul.f32 %v1854_v58, %v711_v30 }
  0x94   : > { %s2610_s15 = sld [smem:[#allocation27_spill]]  ;;  %s2611_s12 = sld [smem:[#allocation28_spill]]  ;;  %v1966_v63 = vmul.f32 %v1854_v58, %v736_v35 }
  0x95   : > { %s1791_s0 = sld [smem:[#allocation2 + $0x18b]]  ;;  %s2621_s13 = sld [smem:[#allocation31_spill]] }
  0x96   : > { %2603 = sst [smem:[#allocation39_spill]] %s1744_s16  ;;  %s2617_s16 = sld [smem:[#allocation30_spill]] }
  0x97   : > { %2604 = sst [smem:[#allocation40_spill]] %s1746_s17  ;;  %s1809_s4 = sld [smem:[#allocation2 + $0x18e]] }
  0x98   : > { %2605 = sst [smem:[#allocation41_spill]] %s1754_s1  ;;  %s2615_s1 = sld [smem:[#allocation29_spill]]  ;;  %v583_v38 = vstv %s2607_s2 }
  0x99   : > { %2606 = sst [smem:[#allocation42_spill]] %s1756_s25  ;;  %s1779_s25 = sld [smem:[#allocation2 + $0x188]]  ;;  %v608_v39 = vstv %s2608_s27  ;;  %v1826_v50 = vmul.f32 %v1771_v29, %v583_v38  ;;  %v761_v38 = vstv %s1708_s21 }
  0x9a   : > { %2609 = sst [smem:[#allocation25_spill]] %s1768_s7  ;;  %s1781_s17 = sld [smem:[#allocation2 + $0x189]]  ;;  %v633_v40 = vstv %s2610_s15  ;;  %v658_v41 = vstv %s2611_s12  ;;  %v1829_v51 = vmul.f32 %v1771_v29, %v608_v39  ;;  %v786_v39 = vstv %s1716_s24 }
  0x9b   : > { %s1789_s7 = sld [smem:[#allocation2 + $0x18a]]  ;;  %2620 = sst [smem:[#allocation28_spill]] %s1791_s0  ;;  %v758_v49 = vstv %s2621_s13  ;;  %v1832_v52 = vmul.f32 %v1771_v29, %v633_v40  ;;  %v1835_v53 = vmul.f32 %v1771_v29, %v658_v41  ;;  %v811_v40 = vstv %s1718_s29 }
  0x9c   : > { %v708_v45 = vstv %s2617_s16  ;;  %s2623_s26 = sld [smem:[#allocation32_spill]]  ;;  %s1811_s0 = sld [smem:[#allocation2 + $0x18f]]  ;;  %v1860_v60 = vmul.f32 %v1771_v29, %v758_v49  ;;  %v836_v41 = vstv %s1726_s9  ;;  %v514_v49 = vstv %s1736_s14 }
  0x9d   : > { %2622 = sst [smem:[#allocation29_spill]] %s1809_s4  ;;  %s1821_s2 = sld [smem:[#allocation7]]  ;;  %v1845_v55 = vmul.f32 %v1771_v29, %v708_v45  ;;  %v1949_v45 = vld [vmem:[%s1625_s8 + $0x6] sm:$0x3]  ;;  %v1969_v0 = vmul.f32 %v1854_v58, %v761_v38  ;;  %v639_v38 = vstv %s1766_s3 }
  0x9e   : > { %v683_v44 = vstv %s2615_s1  ;;  %s1823_s27 = sld [smem:[#allocation7 + $0x1]]  ;;  %s2627_s16 = sld [smem:[#allocation33_spill]]  ;;  %v1992_v11 = vmul.f32 %v1949_v45, %v489_v48  ;;  %v1995_v12 = vmul.f32 %v1949_v45, %v514_v49 }
  0x9f   : > { %2614 = sst [smem:[#allocation26_spill]] %s1779_s25  ;;  %s1797_s25 = sld [smem:[#allocation2 + $0x18c]]  ;;  %v1842_v54 = vmul.f32 %v1771_v29, %v683_v44  ;;  %v861_v44 = vstv %s1728_s10 }
  0xa0   : > { %2616 = sst [smem:[#allocation27_spill]] %s1781_s17  ;;  %s1799_s17 = sld [smem:[#allocation2 + $0x18d]] }
  0xa1   : > { %s2628_s1 = sld [smem:[#allocation34_spill]]  ;;  %s1837_s5 = sld [smem:[#allocation7 + $0x2]] }
  0xa2   : > { %2624 = sst [smem:[#allocation30_spill]] %s1811_s0  ;;  %s1839_s15 = sld [smem:[#allocation7 + $0x3]]  ;;  %v783_v56 = vstv %s2623_s26 }
  0xa3   : > { %2625 = sst [smem:[#allocation31_spill]] %s1821_s2  ;;  %s2631_s12 = sld [smem:[#allocation35_spill]]  ;;  %v1879_v7 = vmul.f32 %v1771_v29, %v783_v56 }
  0xa4   : > { %2626 = sst [smem:[#allocation32_spill]] %s1823_s27  ;;  %s2632_s13 = sld [smem:[#allocation36_spill]]  ;;  %v833_v61 = vstv %s2627_s16 }
  0xa5   : > { %s2633_s27 = sld [smem:[#allocation37_spill]]  ;;  %s1849_s2 = sld [smem:[#allocation7 + $0x80]]  ;;  %2641 = vst [vmem:[#allocation49_spill] sm:$0xff] %v1879_v7  ;;  %v1891_v13 = vmul.f32 %v1771_v29, %v833_v61 }
  0xa6   : > { %s2635_s0 = sld [smem:[#allocation38_spill]]  ;;  %s1851_s4 = sld [smem:[#allocation7 + $0x81]] }
  0xa7   : > { %2629 = sst [smem:[#allocation33_spill]] %s1837_s5  ;;  %v858_v62 = vstv %s2628_s1  ;;  %s1866_s19 = sld [smem:[#allocation7 + $0x83]]  ;;  %2645 = vst [vmem:[#allocation53_spill] sm:$0xff] %v1891_v13 }
  0xa8   : > { %2630 = sst [smem:[#allocation34_spill]] %s1839_s15  ;;  %s1864_s26 = sld [smem:[#allocation7 + $0x82]]  ;;  %v1894_v14 = vmul.f32 %v1771_v29, %v858_v62  ;;  %v686_v29 = vstv %s1702_s22 }
  0xa9   : > { %v536_v1 = vstv %s2631_s12  ;;  %s1884_s16 = sld [smem:[#allocation7 + $0x102]]  ;;  %s1886_s1 = sld [smem:[#allocation7 + $0x103]]  ;;  %v1954_v56 = vmul.f32 %v1854_v58, %v686_v29 }
  0xaa   : > { %v561_v2 = vstv %s2632_s13  ;;  %2646 = vst [vmem:[#allocation54_spill] sm:$0xff] %v1894_v14  ;;  %s1896_s18 = sld [smem:[#allocation7 + $0x180]]  ;;  %s1898_s30 = sld [smem:[#allocation7 + $0x181]]  ;;  %v1907_v19 = vmul.f32 %v1854_v58, %v536_v1  ;;  %v1976_v1 = vmul.f32 %v1854_v58, %v786_v39 }
  0xab   : > { %2634 = sst [smem:[#allocation35_spill]] %s1849_s2  ;;  %s1874_s2 = sld [smem:[#allocation7 + $0x101]]  ;;  %v586_v3 = vstv %s2633_s27  ;;  %v1910_v20 = vmul.f32 %v1854_v58, %v561_v2  ;;  %v1979_v2 = vmul.f32 %v1854_v58, %v811_v40 }
  0xac   : > { %2636 = sst [smem:[#allocation36_spill]] %s1851_s4  ;;  %s1872_s4 = sld [smem:[#allocation7 + $0x100]]  ;;  %v611_v4 = vstv %s2635_s0  ;;  %v1917_v23 = vmul.f32 %v1854_v58, %v586_v3  ;;  %2664 = vst [vmem:[#allocation63_spill] sm:$0xff] %v1976_v1  ;;  %v1982_v3 = vmul.f32 %v1854_v58, %v836_v41 }
  0xad   : > { %2638 = sst [smem:[#allocation38_spill]] %s1866_s19  ;;  %s1912_s20 = sld [smem:[#allocation7 + $0x182]]  ;;  %v1920_v24 = vmul.f32 %v1854_v58, %v611_v4  ;;  %2665 = vst [vmem:[#allocation64_spill] sm:$0xff] %v1979_v2  ;;  %v1985_v4 = vmul.f32 %v1854_v58, %v861_v44  ;;  %v739_v44 = vstv %s1789_s7 }
  0xae   : > { %2637 = sst [smem:[#allocation37_spill]] %s1864_s26  ;;  %s1914_s6 = sld [smem:[#allocation7 + $0x183]]  ;;  %2666 = vst [vmem:[#allocation65_spill] sm:$0xff] %v1982_v3  ;;  %v2036_v3 = vmul.f32 %v1949_v45, %v639_v38  ;;  %v2054_v38 = vmul.f32 %v1949_v45, %v739_v44 }
  0xaf   : > { %2643 = sst [smem:[#allocation51_spill]] %s1884_s16  ;;  %s1924_s0 = sld [smem:[#allocation7 + $0x200]]  ;;  %2668 = vst [vmem:[#allocation66_spill] sm:$0xff] %v1985_v4  ;;  %v814_v4 = vstv %s1799_s17 }
  0xb0   : > { %2644 = sst [smem:[#allocation52_spill]] %s1886_s1  ;;  %s1926_s27 = sld [smem:[#allocation7 + $0x201]] }
  0xb1   : > { %2640 = sst [smem:[#allocation48_spill]] %s1874_s2  ;;  %s2651_s12 = sld [smem:[#allocation39_spill]] }
  0xb2   : > { %2639 = sst [smem:[#allocation47_spill]] %s1872_s4  ;;  %s1936_s13 = sld [smem:[#allocation7 + $0x202]] }
  0xb3   : > { %2647 = sst [smem:[#allocation55_spill]] %s1912_s20  ;;  %s2653_s22 = sld [smem:[#allocation40_spill]] }
  0xb4   : > { %2648 = sst [smem:[#allocation56_spill]] %s1914_s6  ;;  %s1938_s6 = sld [smem:[#allocation7 + $0x203]] }
  0xb5   : > { %2649 = sst [smem:[#allocation57_spill]] %s1924_s0  ;;  %s1944_s23 = sld [smem:[#allocation7 + $0x280]] }
  0xb6   : > { %2650 = sst [smem:[#allocation58_spill]] %s1926_s27  ;;  %s1946_s27 = sld [smem:[#allocation7 + $0x281]] }
  0xb7   : > { %s1959_s21 = sld [smem:[#allocation7 + $0x282]]  ;;  %s1961_s24 = sld [smem:[#allocation7 + $0x283]]  ;;  %v539_v61 = vstv %s2651_s12 }
  0xb8   : > { %2652 = sst [smem:[#allocation39_spill]] %s1936_s13  ;;  %s2658_s28 = sld [smem:[#allocation41_spill]]  ;;  %v2004_v58 = vmul.f32 %v1949_v45, %v539_v61 }
  0xb9   : > { %s2660_s29 = sld [smem:[#allocation42_spill]]  ;;  %v564_v62 = vstv %s2653_s22  ;;  %s1971_s8 = sld [smem:[#allocation7 + $0x300]] }
  0xba   : > { %2654 = sst [smem:[#allocation40_spill]] %s1938_s6  ;;  %s2663_s10 = sld [smem:[#allocation25_spill]]  ;;  %v2007_v35 = vmul.f32 %v1949_v45, %v564_v62  ;;  %v789_v62 = vstv %s1797_s25 }
  0xbb   : > { %2655 = sst [smem:[#allocation59_spill]] %s1944_s23  ;;  %s1973_s9 = sld [smem:[#allocation7 + $0x301]]  ;;  %v2066_v37 = vmul.f32 %v1949_v45, %v789_v62 }
  0xbc   : > { %2656 = sst [smem:[#allocation60_spill]] %s1946_s27  ;;  %s2667_s11 = sld [smem:[#allocation26_spill]] }
  0xbd   : > { %2657 = sst [smem:[#allocation61_spill]] %s1959_s21  ;;  %s2669_s14 = sld [smem:[#allocation27_spill]]  ;;  %2686 = vst [vmem:[#allocation70_spill] sm:$0xff] %v2066_v37 }
  0xbe   : > { %2659 = sst [smem:[#allocation41_spill]] %s1961_s24  ;;  %s1989_s22 = sld [smem:[#allocation7 + $0x303]]  ;;  %v589_v29 = vstv %s2658_s28 }
  0xbf   : > { %2661 = sst [smem:[#allocation42_spill]] %s1971_s8  ;;  %s1987_s12 = sld [smem:[#allocation7 + $0x302]]  ;;  %v614_v30 = vstv %s2660_s29  ;;  %v2024_v49 = vmul.f32 %v1949_v45, %v589_v29 }
  0xc0   : > { %s1999_s8 = sld [smem:[#allocation7 + $0x380]]  ;;  %s2001_s24 = sld [smem:[#allocation7 + $0x381]]  ;;  %v664_v39 = vstv %s2663_s10  ;;  %v2027_v61 = vmul.f32 %v1949_v45, %v614_v30 }
  0xc1   : > { %2662 = sst [smem:[#allocation62_spill]] %s1973_s9  ;;  %s2672_s9 = sld [smem:[#allocation28_spill]]  ;;  %v2039_v14 = vmul.f32 %v1949_v45, %v664_v39 }
  0xc2   : > { %s2013_s21 = sld [smem:[#allocation7 + $0x383]]  ;;  %s2676_s28 = sld [smem:[#allocation30_spill]]  ;;  %v689_v40 = vstv %s2667_s11 }
  0xc3   : > { %v714_v41 = vstv %s2669_s14  ;;  %s2019_s29 = sld [smem:[#allocation7 + $0x400]]  ;;  %s2033_s11 = sld [smem:[#allocation7 + $0x403]]  ;;  %v2048_v30 = vmul.f32 %v1949_v45, %v689_v40 }
  0xc4   : > { %2671 = sst [smem:[#allocation26_spill]] %s1989_s22  ;;  %s2011_s22 = sld [smem:[#allocation7 + $0x382]]  ;;  %v2051_v2 = vmul.f32 %v1949_v45, %v714_v41  ;;  %v2069_v41 = vmul.f32 %v1949_v45, %v814_v4 }
  0xc5   : > { %2670 = sst [smem:[#allocation25_spill]] %s1987_s12  ;;  %s2674_s12 = sld [smem:[#allocation29_spill]] }
  0xc6   : > { %2673 = sst [smem:[#allocation27_spill]] %s2001_s24  ;;  %s2021_s24 = sld [smem:[#allocation7 + $0x401]]  ;;  %2687 = vst [vmem:[#allocation71_spill] sm:$0xff] %v2069_v41 }
  0xc7   : > { %v764_v48 = vstv %s2672_s9  ;;  %s2043_s7 = sld [smem:[#allocation7 + $0x480]]  ;;  %s2045_s25 = sld [smem:[#allocation7 + $0x481]] }
  0xc8   : > { %2675 = sst [smem:[#allocation28_spill]] %s2013_s21  ;;  %s2031_s21 = sld [smem:[#allocation7 + $0x402]]  ;;  %v864_v29 = vstv %s2676_s28  ;;  %v2057_v39 = vmul.f32 %v1949_v45, %v764_v48 }
  0xc9   : > { %2680 = sst [smem:[#allocation30_spill]] %s2033_s11  ;;  %s2059_s14 = sld [smem:[#allocation7 + $0x482]]  ;;  %v2081_v62 = vmul.f32 %v1949_v45, %v864_v29 }
  0xca   : > { %s2071_s28 = sld [smem:[#allocation7 + $0x500]]  ;;  %s2083_s10 = sld [smem:[#allocation7 + $0x502]] }
  0xcb   : > { %v839_v13 = vstv %s2674_s12  ;;  %s2061_s12 = sld [smem:[#allocation7 + $0x483]]  ;;  %2691 = vst [vmem:[#allocation75_spill] sm:$0xff] %v2081_v62  ;;  %s2091_s5 = sld [smem:[#allocation7 + $0x580]] }
  0xcc   : > { %2677 = sst [smem:[#allocation29_spill]] %s2021_s24  ;;  %v2078_v36 = vmul.f32 %v1949_v45, %v839_v13  ;;  %s2085_s3 = sld [smem:[#allocation7 + $0x503]] }
  0xcd   : > { %2681 = sst [smem:[#allocation67_spill]] %s2043_s7  ;;  %s2099_s17 = sld [smem:[#allocation7 + $0x582]] }
  0xce   : > { %2682 = sst [smem:[#allocation68_spill]] %s2045_s25  ;;  %2690 = vst [vmem:[#allocation74_spill] sm:$0xff] %v2078_v36  ;;  %s2101_s26 = sld [smem:[#allocation7 + $0x583]] }
  0xcf   : > { %s2073_s25 = sld [smem:[#allocation7 + $0x501]]  ;;  %s2107_s4 = sld [smem:[#allocation7 + $0x600]] }
  0xd0   : > { %2688 = sst [smem:[#allocation72_spill]] %s2071_s28  ;;  %s2109_s2 = sld [smem:[#allocation7 + $0x601]] }
  0xd1   : > { %2685 = sst [smem:[#allocation69_spill]] %s2061_s12  ;;  %s2119_s28 = sld [smem:[#allocation5]] }
  0xd2   : > { %2692 = sst [smem:[#allocation76_spill]] %s2083_s10  ;;  %s2121_s20 = sld [smem:[#allocation5 + $0x1]] }
  0xd3   : > { %2693 = sst [smem:[#allocation77_spill]] %s2085_s3  ;;  %s2710_s13 = sld [smem:[#allocation68_spill]] }
  0xd4   : > { %2696 = sst [smem:[#allocation78_spill]] %s2091_s5  ;;  %s2127_s6 = sld [smem:[#allocation5 + $0x2]] }
  0xd5   : > { %2689 = sst [smem:[#allocation73_spill]] %s2073_s25  ;;  %s2093_s25 = sld [smem:[#allocation7 + $0x581]] }
  0xd6   : > { %2700 = sst [smem:[#allocation80_spill]] %s2099_s17  ;;  %s2129_s27 = sld [smem:[#allocation5 + $0x3]] }
  0xd7   : > { %2701 = sst [smem:[#allocation81_spill]] %s2101_s26  ;;  %s2712_s10 = sld [smem:[#allocation73_spill]]  ;;  %v431_v13 = vstv %s2119_s28 }
  0xd8   : > { %2706 = sst [smem:[#allocation82_spill]] %s2107_s4  ;;  %s2135_s23 = sld [smem:[#allocation5 + $0x4]]  ;;  %v433_v36 = vstv %s2121_s20  ;;  %v482_v44 = vadd.f32 %v1710_v5, %v431_v13 }
  0xd9   : > { %2707 = sst [smem:[#allocation83_spill]] %s2109_s2  ;;  %s2137_s9 = sld [smem:[#allocation5 + $0x5]]  ;;  %v507_v40 = vadd.f32 %v1712_v6, %v433_v36 }
  0xda   : > { %s2143_s0 = sld [smem:[#allocation5 + $0x6]]  ;;  %s2145_s1 = sld [smem:[#allocation5 + $0x7]]  ;;  %v435_v4 = vstv %s2127_s6  ;;  %v485_v5 = vadd.f32 %v1802_v42, %v482_v44 }
  0xdb   : > { %2697 = sst [smem:[#allocation79_spill]] %s2093_s25  ;;  %s2153_s24 = sld [smem:[#allocation5 + $0x9]]  ;;  %v532_v45 = vadd.f32 %v1720_v9, %v435_v4  ;;  %v510_v6 = vadd.f32 %v1805_v43, %v507_v40 }
  0xdc   : > { %s2151_s16 = sld [smem:[#allocation5 + $0x8]]  ;;  %s2159_s11 = sld [smem:[#allocation5 + $0xa]]  ;;  %v437_v29 = vstv %s2129_s27  ;;  %v488_v37 = vadd.f32 %v1901_v15, %v485_v5 }
  0xdd   : > { %s2161_s7 = sld [smem:[#allocation5 + $0xb]]  ;;  %s2169_s12 = sld [smem:[#allocation5 + $0xc]]  ;;  %v557_v48 = vadd.f32 %v1722_v10, %v437_v29  ;;  %v535_v9 = vadd.f32 %v1814_v46, %v532_v45  ;;  %v513_v41 = vadd.f32 %v1904_v16, %v510_v6 }
  0xde   : > { %s2171_s3 = sld [smem:[#allocation5 + $0xd]]  ;;  %s2177_s5 = sld [smem:[#allocation5 + $0xe]]  ;;  %v439_v1 = vstv %s2135_s23  ;;  %v491_v46 = vadd.f32 %v1992_v11, %v488_v37 }
  0xdf   : > { %s2179_s25 = sld [smem:[#allocation5 + $0xf]]  ;;  %v441_v62 = vstv %s2137_s9  ;;  %s2185_s20 = sld [smem:[#allocation8]]  ;;  %v560_v10 = vadd.f32 %v1817_v47, %v557_v48  ;;  %v538_v43 = vadd.f32 %v1907_v19, %v535_v9  ;;  %v516_v47 = vadd.f32 %v1995_v12, %v513_v41 }
  0xe0   : > { %s2187_s28 = sld [smem:[#allocation8 + $0x1]]  ;;  %s2193_s6 = sld [smem:[#allocation8 + $0x2]]  ;;  %v492_v5 = vmax.f32 %v491_v46, 0.0  ;;  %v582_v11 = vadd.f32 %v1738_v17, %v439_v1  ;;  %v607_v12 = vadd.f32 %v1740_v18, %v441_v62 }
  0xe1   : > { %s2195_s27 = sld [smem:[#allocation8 + $0x3]]  ;;  %v563_v40 = vadd.f32 %v1910_v20, %v560_v10  ;;  %s2719_s23 = sld [smem:[#allocation31_spill]]  ;;  %v541_v16 = vadd.f32 %v2004_v58, %v538_v43  ;;  %v517_v6 = vmax.f32 %v516_v47, 0.0 }
  0xe2   : > { %s2720_s9 = sld [smem:[#allocation32_spill]]  ;;  %s2721_s2 = sld [smem:[#allocation33_spill]] }
  0xe3   : > { %s2722_s4 = sld [smem:[#allocation34_spill]]  ;;  %s2723_s26 = sld [smem:[#allocation35_spill]]  ;;  %v566_v19 = vadd.f32 %v2007_v35, %v563_v40  ;;  %v542_v9 = vmax.f32 %v541_v16, 0.0 }
  0xe4   : > { %2717 = sst [smem:[#allocation68_spill]] %s2177_s5  ;;  %s2724_s17 = sld [smem:[#allocation36_spill]] }
  0xe5   : > { %2718 = sst [smem:[#allocation73_spill]] %s2179_s25  ;;  %v463_v48 = vstv %s2185_s20  ;;  %s2725_s15 = sld [smem:[#allocation37_spill]]  ;;  %v567_v37 = vmax.f32 %v566_v19, 0.0 }
  0xe6   : > { %v465_v15 = vstv %s2187_s28  ;;  %s2726_s19 = sld [smem:[#allocation38_spill]]  ;;  %v467_v20 = vstv %s2193_s6  ;;  %s2727_s25 = sld [smem:[#allocation47_spill]] }
  0xe7   : > { %v469_v45 = vstv %s2195_s27  ;;  %s2728_s5 = sld [smem:[#allocation48_spill]]  ;;  %s2729_s20 = sld [smem:[#allocation51_spill]]  ;;  %v2730_v41 = vstv %s2719_s23 }
  0xe8   : > { %s2731_s28 = sld [smem:[#allocation52_spill]]  ;;  %v494_v58 = vmul.f32 %v2730_v41, %v492_v5  ;;  %v2732_v10 = vstv %s2720_s9  ;;  %v2733_v35 = vstv %s2721_s2  ;;  %s2739_s6 = sld [smem:[#allocation55_spill]] }
  0xe9   : > { %v497_v43 = vmul.f32 %v2732_v10, %v492_v5  ;;  %v500_v40 = vmul.f32 %v2733_v35, %v492_v5  ;;  %v2734_v13 = vstv %s2722_s4  ;;  %v2735_v46 = vstv %s2723_s26  ;;  %s2740_s27 = sld [smem:[#allocation56_spill]]  ;;  %s2755_s4 = sld [smem:[#allocation57_spill]] }
  0xea   : > { %v503_v44 = vmul.f32 %v2734_v13, %v492_v5  ;;  %v519_v47 = vmul.f32 %v2735_v46, %v517_v6  ;;  %v2736_v16 = vstv %s2724_s17  ;;  %v495_v62 = vadd.f32 %v494_v58, %v463_v48  ;;  %s2756_s2 = sld [smem:[#allocation58_spill]]  ;;  %s2759_s26 = sld [smem:[#allocation59_spill]] }
  0xeb   : > { %v522_v19 = vmul.f32 %v2736_v16, %v517_v6  ;;  %v2737_v42 = vstv %s2725_s15  ;;  %v498_v41 = vadd.f32 %v497_v43, %v465_v15  ;;  %v501_v8 = vadd.f32 %v500_v40, %v467_v20  ;;  %s2758_s15 = sld [smem:[#allocation40_spill]]  ;;  %s2329_s17 = sld [smem:[#allocation7 + $0x603]] }
  0xec   : > { %v525_v17 = vmul.f32 %v2737_v42, %v517_v6  ;;  %v2738_v1 = vstv %s2726_s19  ;;  %v504_v10 = vadd.f32 %v503_v44, %v469_v45  ;;  %v2741_v29 = vstv %s2727_s25  ;;  %s2760_s19 = sld [smem:[#allocation60_spill]]  ;;  %s2327_s25 = sld [smem:[#allocation7 + $0x602]] }
  0xed   : > { %v528_v18 = vmul.f32 %v2738_v1, %v517_v6  ;;  %v544_v35 = vmul.f32 %v2741_v29, %v542_v9  ;;  %v2742_v4 = vstv %s2728_s5  ;;  %v2743_v5 = vstv %s2729_s20  ;;  %s2757_s5 = sld [smem:[#allocation39_spill]]  ;;  %s2785_s23 = sld [smem:[#allocation29_spill]] }
  0xee   : > { %v547_v13 = vmul.f32 %v2742_v4, %v542_v9  ;;  %v550_v46 = vmul.f32 %v2743_v5, %v542_v9  ;;  %v2744_v36 = vstv %s2731_s28  ;;  %v520_v7 = vadd.f32 %v519_v47, %v495_v62  ;;  %s2786_s9 = sld [smem:[#allocation30_spill]]  ;;  %s2787_s20 = sld [smem:[#allocation67_spill]] }
  0xef   : > { %v553_v16 = vmul.f32 %v2744_v36, %v542_v9  ;;  %v523_v42 = vadd.f32 %v522_v19, %v498_v41  ;;  %v526_v33 = vadd.f32 %v525_v17, %v501_v8  ;;  %v529_v32 = vadd.f32 %v528_v18, %v504_v10  ;;  %s2788_s28 = sld [smem:[#allocation69_spill]] }
  0xf0   : > { %v2745_v6 = vstv %s1896_s18  ;;  %v2746_v48 = vstv %s1898_s30  ;;  %v2747_v20 = vstv %s2739_s6  ;;  %v2748_v45 = vstv %s2740_s27  ;;  %s2769_s18 = sld [smem:[#allocation42_spill]]  ;;  %s2771_s30 = sld [smem:[#allocation62_spill]] }
  0xf1   : > { %v569_v1 = vmul.f32 %v2745_v6, %v567_v37  ;;  %v572_v15 = vmul.f32 %v2746_v48, %v567_v37  ;;  %v575_v44 = vmul.f32 %v2747_v20, %v567_v37  ;;  %v578_v29 = vmul.f32 %v2748_v45, %v567_v37  ;;  %s2353_s6 = sld [smem:[#allocation7 + $0x682]]  ;;  %s2797_s27 = sld [smem:[#allocation72_spill]] }
  0xf2   : > { %v545_v58 = vadd.f32 %v544_v35, %v520_v7  ;;  %v548_v4 = vadd.f32 %v547_v13, %v523_v42  ;;  %v551_v43 = vadd.f32 %v550_v46, %v526_v33  ;;  %v554_v36 = vadd.f32 %v553_v16, %v529_v32 }
  0xf3   : > { %v585_v9 = vadd.f32 %v1826_v50, %v582_v11  ;;  %v610_v8 = vadd.f32 %v1829_v51, %v607_v12  ;;  %v2749_v40 = vstv %s2143_s0  ;;  %v2750_v19 = vstv %s2145_s1  ;;  %s2762_s1 = sld [smem:[#allocation41_spill]] }
  0xf4   : > { %v632_v47 = vadd.f32 %v1748_v21, %v2749_v40  ;;  %v657_v17 = vadd.f32 %v1750_v22, %v2750_v19  ;;  %v570_v18 = vadd.f32 %v569_v1, %v545_v58  ;;  %v573_v37 = vadd.f32 %v572_v15, %v548_v4  ;;  %s2773_s0 = sld [smem:[#allocation25_spill]] }
  0xf5   : > { %v576_v7 = vadd.f32 %v575_v44, %v551_v43  ;;  %v579_v62 = vadd.f32 %v578_v29, %v554_v36  ;;  %v588_v41 = vadd.f32 %v1917_v23, %v585_v9  ;;  %v613_v33 = vadd.f32 %v1920_v24, %v610_v8 }
  0xf6   : > { %v635_v32 = vadd.f32 %v1832_v52, %v632_v47  ;;  %v660_v50 = vadd.f32 %v1835_v53, %v657_v17  ;;  %v2751_v11 = vstv %s2151_s16  ;;  %v2752_v12 = vstv %s2153_s24  ;;  %s2761_s16 = sld [smem:[#allocation61_spill]]  ;;  %s2774_s24 = sld [smem:[#allocation26_spill]] }
  0xf7   : > { %v682_v51 = vadd.f32 %v1758_v25, %v2751_v11  ;;  %v707_v21 = vadd.f32 %v1760_v26, %v2752_v12  ;;  %v2753_v10 = vstv %s2159_s11  ;;  %v2754_v35 = vstv %s2161_s7  ;;  %s2775_s11 = sld [smem:[#allocation27_spill]]  ;;  %s2776_s7 = sld [smem:[#allocation28_spill]] }
  0xf8   : > { %v732_v22 = vadd.f32 %v1762_v27, %v2753_v10  ;;  %v757_v13 = vadd.f32 %v1764_v28, %v2754_v35  ;;  %v591_v23 = vadd.f32 %v2024_v49, %v588_v41  ;;  %v616_v24 = vadd.f32 %v2027_v61, %v613_v33 }
  0xf9   : > { %v638_v52 = vadd.f32 %v1929_v31, %v635_v32  ;;  %v663_v25 = vadd.f32 %v1932_v34, %v660_v50  ;;  %v685_v26 = vadd.f32 %v1842_v54, %v682_v51  ;;  %v710_v27 = vadd.f32 %v1845_v55, %v707_v21 }
  0xfa   : > { %v735_v28 = vadd.f32 %v1857_v59, %v732_v22  ;;  %v760_v53 = vadd.f32 %v1860_v60, %v757_v13  ;;  %v592_v49 = vmax.f32 %v591_v23, 0.0  ;;  %v617_v61 = vmax.f32 %v616_v24, 0.0 }
  0xfb   : > { %v641_v31 = vadd.f32 %v2036_v3, %v638_v52  ;;  %v666_v5 = vadd.f32 %v2039_v14, %v663_v25  ;;  %v688_v34 = vadd.f32 %v1954_v56, %v685_v26  ;;  %v713_v54 = vadd.f32 %v1957_v57, %v710_v27 }
  0xfc   : > { %v738_v46 = vadd.f32 %v1966_v63, %v735_v28  ;;  %v763_v55 = vadd.f32 %v1969_v0, %v760_v53  ;;  %v2763_v16 = vstv %s2755_s4  ;;  %v2764_v42 = vstv %s2756_s2  ;;  %s2799_s4 = sld [smem:[#allocation77_spill]]  ;;  %s2357_s2 = sld [smem:[#allocation7 + $0x700]] }
  0xfd   : > { %v594_v59 = vmul.f32 %v2763_v16, %v592_v49  ;;  %v597_v6 = vmul.f32 %v2764_v42, %v592_v49  ;;  %v2765_v60 = vstv %s2757_s5  ;;  %v2766_v48 = vstv %s2758_s15  ;;  %s2805_s5 = sld [smem:[#allocation79_spill]]  ;;  %s2806_s15 = sld [smem:[#allocation80_spill]] }
  0xfe   : > { %v600_v1 = vmul.f32 %v2765_v60, %v592_v49  ;;  %v603_v15 = vmul.f32 %v2766_v48, %v592_v49  ;;  %v2767_v20 = vstv %s2759_s26  ;;  %v2768_v44 = vstv %s2760_s19  ;;  %s2807_s26 = sld [smem:[#allocation81_spill]] }
  0xff   : > { %v619_v3 = vmul.f32 %v2767_v20, %v617_v61  ;;  %v622_v14 = vmul.f32 %v2768_v44, %v617_v61  ;;  %v2770_v56 = vstv %s2761_s16  ;;  %v2772_v45 = vstv %s2762_s1  ;;  %s2367_s19 = sld [smem:[#allocation7 + $0x702]]  ;;  %s2369_s16 = sld [smem:[#allocation7 + $0x703]] }
 0x100   : > { %v625_v57 = vmul.f32 %v2770_v56, %v617_v61  ;;  %v628_v63 = vmul.f32 %v2772_v45, %v617_v61  ;;  %v595_v0 = vadd.f32 %v594_v59, %v570_v18  ;;  %v598_v29 = vadd.f32 %v597_v6, %v573_v37  ;;  %s2383_s1 = sld [smem:[#allocation7 + $0x780]] }
 0x101   : > { %v601_v58 = vadd.f32 %v600_v1, %v576_v7  ;;  %v604_v4 = vadd.f32 %v603_v15, %v579_v62  ;;  %v642_v43 = vmax.f32 %v641_v31, 0.0  ;;  %v667_v36 = vmax.f32 %v666_v5, 0.0 }
 0x102   : > { %v691_v9 = vadd.f32 %v2048_v30, %v688_v34  ;;  %v716_v8 = vadd.f32 %v2051_v2, %v713_v54  ;;  %v620_v40 = vadd.f32 %v619_v3, %v595_v0  ;;  %v623_v47 = vadd.f32 %v622_v14, %v598_v29 }
 0x103   : > { %v626_v19 = vadd.f32 %v625_v57, %v601_v58  ;;  %v629_v17 = vadd.f32 %v628_v63, %v604_v4  ;;  %v2777_v41 = vstv %s2769_s18  ;;  %v2778_v18 = vstv %s2771_s30  ;;  %v2801_v63 = vld [vmem:[#allocation43_spill] sm:$0xff]  ;;  %v2803_v58 = vld [vmem:[#allocation44_spill] sm:$0xff]  ;;  %s2385_s18 = sld [smem:[#allocation7 + $0x781]]  ;;  %s2407_s30 = sld [smem:[#allocation7 + $0x782]] }
 0x104   : > { %v644_v33 = vmul.f32 %v2777_v41, %v642_v43  ;;  %v647_v32 = vmul.f32 %v2778_v18, %v642_v43  ;;  %v2779_v37 = vstv %s2773_s0  ;;  %v2780_v7 = vstv %s2774_s24  ;;  %s2409_s0 = sld [smem:[#allocation7 + $0x783]] }
 0x105   : > { %v650_v50 = vmul.f32 %v2779_v37, %v642_v43  ;;  %v653_v11 = vmul.f32 %v2780_v7, %v642_v43  ;;  %v2781_v62 = vstv %s1999_s8  ;;  %v2782_v12 = vstv %s2775_s11  ;;  %s2331_s8 = sld [smem:[#allocation7 + $0x680]]  ;;  %s2832_s11 = sld [smem:[#allocation82_spill]] }
 0x106   : > { %v669_v51 = vmul.f32 %v2781_v62, %v667_v36  ;;  %v672_v21 = vmul.f32 %v2782_v12, %v667_v36  ;;  %v2783_v10 = vstv %s2011_s22  ;;  %v2784_v22 = vstv %s2776_s7  ;;  %s2333_s22 = sld [smem:[#allocation7 + $0x681]]  ;;  %s2834_s7 = sld [smem:[#allocation83_spill]] }
 0x107   : > { %v675_v30 = vmul.f32 %v2783_v10, %v667_v36  ;;  %v678_v2 = vmul.f32 %v2784_v22, %v667_v36  ;;  %v645_v35 = vadd.f32 %v644_v33, %v620_v40  ;;  %v648_v13 = vadd.f32 %v647_v32, %v623_v47 }
 0x108   : > { %v651_v23 = vadd.f32 %v650_v50, %v626_v19  ;;  %v654_v24 = vadd.f32 %v653_v11, %v629_v17  ;;  %v692_v52 = vmax.f32 %v691_v9, 0.0  ;;  %v717_v25 = vmax.f32 %v716_v8, 0.0 }
 0x109   : > { %v741_v26 = vadd.f32 %v2054_v38, %v738_v46  ;;  %v766_v27 = vadd.f32 %v2057_v39, %v763_v55  ;;  %v670_v28 = vadd.f32 %v669_v51, %v645_v35  ;;  %v673_v53 = vadd.f32 %v672_v21, %v648_v13  ;;  %v2818_v35 = vld [vmem:[#allocation49_spill] sm:$0xff] }
 0x10a   : > { %v676_v49 = vadd.f32 %v675_v30, %v651_v23  ;;  %v679_v61 = vadd.f32 %v678_v2, %v654_v24  ;;  %v2789_v31 = vstv %s2019_s29  ;;  %v2790_v34 = vstv %s2785_s23  ;;  %s2355_s29 = sld [smem:[#allocation7 + $0x683]]  ;;  %v2819_v23 = vld [vmem:[#allocation50_spill] sm:$0xff] }
 0x10b   : > { %v694_v5 = vmul.f32 %v2789_v31, %v692_v52  ;;  %v697_v54 = vmul.f32 %v2790_v34, %v692_v52  ;;  %v2791_v16 = vstv %s2031_s21  ;;  %v2792_v42 = vstv %s2786_s9  ;;  %s2798_s21 = sld [smem:[#allocation76_spill]]  ;;  %v2825_v34 = vld [vmem:[#allocation63_spill] sm:$0xff] }
 0x10c   : > { %v700_v59 = vmul.f32 %v2791_v16, %v692_v52  ;;  %v703_v6 = vmul.f32 %v2792_v42, %v692_v52  ;;  %v2793_v60 = vstv %s2787_s20  ;;  %v2794_v48 = vstv %s2710_s13  ;;  %s2359_s13 = sld [smem:[#allocation7 + $0x701]]  ;;  %v2826_v16 = vld [vmem:[#allocation64_spill] sm:$0xff]  ;;  %v2827_v42 = vld [vmem:[#allocation53_spill] sm:$0xff] }
 0x10d   : > { %v719_v1 = vmul.f32 %v2793_v60, %v717_v25  ;;  %v722_v38 = vmul.f32 %v2794_v48, %v717_v25  ;;  %v2795_v46 = vstv %s2059_s14  ;;  %v2796_v55 = vstv %s2788_s28  ;;  %s2804_s14 = sld [smem:[#allocation78_spill]]  ;;  %v2828_v60 = vld [vmem:[#allocation54_spill] sm:$0xff] }
 0x10e   : > { %v725_v39 = vmul.f32 %v2795_v46, %v717_v25  ;;  %v728_v15 = vmul.f32 %v2796_v55, %v717_v25  ;;  %v695_v20 = vadd.f32 %v694_v5, %v670_v28  ;;  %v698_v3 = vadd.f32 %v697_v54, %v673_v53  ;;  %v2821_v25 = vld [vmem:[#allocation45_spill] sm:$0xff]  ;;  %v2823_v28 = vld [vmem:[#allocation46_spill] sm:$0xff]  ;;  %v2829_v55 = vld [vmem:[#allocation70_spill] sm:$0xff] }
 0x10f   : > { %v701_v44 = vadd.f32 %v700_v59, %v676_v49  ;;  %v704_v14 = vadd.f32 %v703_v6, %v679_v61  ;;  %v742_v56 = vmax.f32 %v741_v26, 0.0  ;;  %v767_v57 = vmax.f32 %v766_v27, 0.0 }
 0x110   : > { %v2800_v45 = vstv %s2169_s12  ;;  %v2802_v29 = vstv %s2171_s3  ;;  %v720_v43 = vadd.f32 %v719_v1, %v695_v20  ;;  %v723_v36 = vadd.f32 %v722_v38, %v698_v3  ;;  %s2810_s12 = sld [smem:[#allocation68_spill]]  ;;  %s2812_s3 = sld [smem:[#allocation73_spill]]  ;;  %v2830_v20 = vld [vmem:[#allocation71_spill] sm:$0xff] }
 0x111   : > { %v782_v0 = vadd.f32 %v2801_v63, %v2800_v45  ;;  %v807_v4 = vadd.f32 %v2803_v58, %v2802_v29  ;;  %v726_v9 = vadd.f32 %v725_v39, %v701_v44  ;;  %v729_v8 = vadd.f32 %v728_v15, %v704_v14  ;;  %v2831_v44 = vld [vmem:[#allocation65_spill] sm:$0xff] }
 0x112   : > { %v2808_v40 = vstv %s2797_s27  ;;  %v2809_v19 = vstv %s2712_s10  ;;  %v2811_v41 = vstv %s2798_s21  ;;  %v2813_v18 = vstv %s2799_s4  ;;  %s2824_s10 = sld [smem:[#allocation16_spill]]  ;;  %s1458_s4 = smov [#allocation10]  }
 0x113   : > { %v744_v47 = vmul.f32 %v2808_v40, %v742_v56  ;;  %v747_v17 = vmul.f32 %v2809_v19, %v742_v56  ;;  %v750_v33 = vmul.f32 %v2811_v41, %v742_v56  ;;  %v753_v32 = vmul.f32 %v2813_v18, %v742_v56  ;;  %v2833_v56 = vld [vmem:[#allocation66_spill] sm:$0xff] }
 0x114   : > { %v799_v37 = vstv %s2327_s25  ;;  %v802_v50 = vstv %s2329_s17  ;;  %v818_v7 = vstv %s2331_s8  ;;  %v821_v11 = vstv %s2333_s22  ;;  %v2836_v40 = vld [vmem:[#allocation75_spill] sm:$0xff]  ;;  %s2839_s17 = sld [smem:[#allocation18_spill]]  ;;  %s2840_s8 = sld [smem:[#allocation22_spill]] }
 0x115   : > { %v2814_v62 = vstv %s2804_s14  ;;  %v2815_v12 = vstv %s2805_s5  ;;  %v2816_v10 = vstv %s2806_s15  ;;  %v2817_v22 = vstv %s2807_s26 }
 0x116   : > { %v769_v51 = vmul.f32 %v2814_v62, %v767_v57  ;;  %v772_v21 = vmul.f32 %v2815_v12, %v767_v57  ;;  %v775_v30 = vmul.f32 %v2816_v10, %v767_v57  ;;  %v778_v2 = vmul.f32 %v2817_v22, %v767_v57 }
 0x117   : > { %v785_v13 = vadd.f32 %v2818_v35, %v782_v0  ;;  %v810_v24 = vadd.f32 %v2819_v23, %v807_v4  ;;  %v2820_v52 = vstv %s2810_s12  ;;  %v2822_v27 = vstv %s2812_s3 }
 0x118   : > { %v832_v26 = vadd.f32 %v2821_v25, %v2820_v52  ;;  %v857_v53 = vadd.f32 %v2823_v28, %v2822_v27  ;;  %v745_v49 = vadd.f32 %v744_v47, %v720_v43  ;;  %v748_v61 = vadd.f32 %v747_v17, %v723_v36  ;;  %s291_s24 = sand.u32 1, %s2824_s10  }
 0x119   : > { %v751_v31 = vadd.f32 %v750_v33, %v726_v9  ;;  %v754_v5 = vadd.f32 %v753_v32, %v729_v8  ;;  %v788_v54 = vadd.f32 %v2825_v34, %v785_v13  ;;  %v813_v59 = vadd.f32 %v2826_v16, %v810_v24  ;;  %s2424_s25 = sshll.u32 %s291_s24, 3  ;;  %v2835_v9 = vld [vmem:[#allocation74_spill] sm:$0xff]  ;;  %s2447_s27 = scalar_lea.sflag [#allocation3], %s291_s24 }
 0x11a   : > { %v835_v6 = vadd.f32 %v2827_v42, %v832_v26  ;;  %v860_v1 = vadd.f32 %v2828_v60, %v857_v53  ;;  %v824_v48 = vstv %s2353_s6  ;;  %v827_v38 = vstv %s2355_s29  ;;  %s1199_s23 = sshll.u32 %s2839_s17, 7  ;;  %s293_s9 = scalar_lea.vmem [#allocation10], %s2424_s25 }
 0x11b   : > { %v843_v46 = vstv %s2357_s2  ;;  %v846_v39 = vstv %s2359_s13  ;;  %v791_v15 = vadd.f32 %v2829_v55, %v788_v54  ;;  %v816_v3 = vadd.f32 %v2830_v20, %v813_v59  ;;  %s902_s20 = sshll.u32 %s293_s9, 4  ;;  %s2841_s6 = sld [smem:[#allocation89_spill]]  ;;  %s2443_s20 = int_to_ptr.vmem [resolvable:$true] %s902_s20 }
 0x11c   : > { %v838_v14 = vadd.f32 %v2831_v44, %v835_v6  ;;  %v863_v57 = vadd.f32 %v2833_v56, %v860_v1  ;;  %v770_v45 = vadd.f32 %v769_v51, %v745_v49  ;;  %v773_v63 = vadd.f32 %v772_v21, %v748_v61  ;;  %s1360_s21 = scalar_lea.vmem %s2443_s20, 128  ;;  %p2842_p9 = scmp.ne.s32.totalorder %s2840_s8, 0 }
 0x11d   : > { %v849_v0 = vstv %s2367_s19  ;;  %v852_v29 = vstv %s2369_s16  ;;  %v776_v58 = vadd.f32 %v775_v30, %v751_v31  ;;  %v779_v4 = vadd.f32 %v778_v2, %v754_v5  ;;  %p1361_p1 = scmp.ne.s32.totalorder %s2443_s20, %s1360_s21  ;;  %s1364_s2 = sshll.u32 %s1458_s4, 4  ;;  %s1365_s2 = int_to_ptr.vmem [resolvable:$false] %s1364_s2 }
 0x11e   : > { %v792_v43 = vmax.f32 %v791_v15, 0.0  ;;  %v817_v36 = vmax.f32 %v816_v3, 0.0  ;;  %v841_v8 = vadd.f32 %v2835_v9, %v838_v14  ;;  %v866_v47 = vadd.f32 %v2836_v40, %v863_v57  ;;  %s1366_s13 = scalar_lea.vmem %s1365_s2, 256  ;;  %p1367_p4 = scmp.lt.s32.totalorder %s2443_s20, %s1365_s2 }
 0x11f   : > { %v868_v19 = vstv %s2383_s1  ;;  %v871_v17 = vstv %s2385_s18  ;;  %v2837_v41 = vstv %s2832_s11  ;;  %v2838_v18 = vstv %s2834_s7  ;;  %p1362_p8 = pnand %p1361_p1, %p2842_p9  ;;  %p1368_p10 = scmp.lt.s32.totalorder %s1366_s13, %s1360_s21 }
 0x120   : > { %v794_v33 = vmul.f32 %v2837_v41, %v792_v43  ;;  %v797_v32 = vmul.f32 %v2838_v18, %v792_v43  ;;  %v800_v62 = vmul.f32 %v799_v37, %v792_v43  ;;  %v803_v51 = vmul.f32 %v802_v50, %v792_v43 }
 0x121   : > { %v819_v12 = vmul.f32 %v818_v7, %v817_v36  ;;  %v822_v21 = vmul.f32 %v821_v11, %v817_v36  ;;  %v825_v10 = vmul.f32 %v824_v48, %v817_v36  ;;  %v828_v30 = vmul.f32 %v827_v38, %v817_v36  ;;  %s2441_s29 = scalar_lea.hbm %s2841_s6, %s1199_s23  ;;  %p1363_p12 = pneg %p1362_p8 }
 0x122   : > { %v795_v22 = vadd.f32 %v794_v33, %v770_v45  ;;  %v798_v2 = vadd.f32 %v797_v32, %v773_v63  ;;  %v801_v35 = vadd.f32 %v800_v62, %v776_v58  ;;  %v804_v13 = vadd.f32 %v803_v51, %v779_v4  ;;  %p1369_p11 = por %p1368_p10, %p1367_p4 }
 0x123   : > { %v842_v23 = vmax.f32 %v841_v8, 0.0  ;;  %v867_v24 = vmax.f32 %v866_v47, 0.0  ;;  %v874_v52 = vstv %s2407_s30  ;;  %v877_v25 = vstv %s2409_s0 }
 0x124   : > { %v820_v26 = vadd.f32 %v819_v12, %v795_v22  ;;  %v823_v27 = vadd.f32 %v822_v21, %v798_v2  ;;  %v826_v28 = vadd.f32 %v825_v10, %v801_v35  ;;  %v829_v53 = vadd.f32 %v828_v30, %v804_v13  ;;  %p1370_p0 = pnand %p1369_p11, %p1363_p12 }
 0x125   : > { %v844_v37 = vmul.f32 %v843_v46, %v842_v23  ;;  %v847_v50 = vmul.f32 %v846_v39, %v842_v23  ;;  %v850_v7 = vmul.f32 %v849_v0, %v842_v23  ;;  %v853_v11 = vmul.f32 %v852_v29, %v842_v23 }
 0x126   : > { %v869_v49 = vmul.f32 %v868_v19, %v867_v24  ;;  %v872_v61 = vmul.f32 %v871_v17, %v867_v24  ;;  %v875_v31 = vmul.f32 %v874_v52, %v867_v24  ;;  %v878_v5 = vmul.f32 %v877_v25, %v867_v24 }
 0x127   : > { %v845_v34 = vadd.f32 %v844_v37, %v820_v26  ;;  %v848_v54 = vadd.f32 %v847_v50, %v823_v27  ;;  %v851_v16 = vadd.f32 %v850_v7, %v826_v28  ;;  %v854_v59 = vadd.f32 %v853_v11, %v829_v53 }
 0x129   : > { %v870_v42 = vadd.f32 %v869_v49, %v845_v34  ;;  %v873_v6 = vadd.f32 %v872_v61, %v848_v54  ;;  %v876_v60 = vadd.f32 %v875_v31, %v851_v16  ;;  %v879_v1 = vadd.f32 %v878_v5, %v854_v59 }
 0x12b   : > { %880 = vst [vmem:[%s293_s9] sm:$0x3] %v870_v42  ;;  %1190 = vst [vmem:[%s293_s9 + $0x2] sm:$0x3] %v873_v6 }
 0x12c   : > { %1191 = vst [vmem:[%s293_s9 + $0x4] sm:$0x3] %v876_v60  ;;  %1192 = vst [vmem:[%s293_s9 + $0x6] sm:$0x3] %v879_v1 }
 0x12d   : > { %1373 = shalt.err (!%p1370_p0)
}
 0x12e   : > { %s1374_s14 = scalar_lea.hbm %s2441_s29, 128  ;;  %s1378_s26 = scalar_lea.hbm %s2841_s6, 256 }
 0x12f   : > { %p1375_p2 = scmp.ne.s32.totalorder %s2441_s29, %s1374_s14  ;;  %p1379_p6 = scmp.lt.u32.totalorder %s2441_s29, %s2841_s6 }
 0x130   : > { %p1380_p7 = scmp.lt.u32.totalorder %s1378_s26, %s1374_s14  ;;  %p1382_p1 = scmp.lt.u32.totalorder %s1374_s14, %s2441_s29 }
 0x131   : > { %p1376_p3 = pnand %p1375_p2, %p2842_p9 }
 0x132   : > { %p1381_p13 = por %p1380_p7, %p1379_p6 }
 0x133   : > { %p1377_p5 = pneg %p1376_p3 }
 0x134   : > { %p1383_p8 = por %p1382_p1, %p1381_p13 }
 0x136   : > { %p1384_p12 = pnand %p1383_p8, %p1377_p5 }
 0x138   : > { %1387 = shalt.err (!%p1384_p12)
}
 0x139   : > { %s1459_s12 = smov 32   ;;  %s1460_s3 = smov 2  }
 0x13a   : > { %1216 = dma.vmem_to_hbm [thread:$0]  (%p2842_p9), %s2443_s20, 128, %s2441_s29, %s2447_s27, %s1459_s12, %s1459_s12, %s1460_s3  }
 0x13b PF: > { %s2843_s1 = sld [smem:[#allocation20_spill]]  ;;  %s2844_s18 = sld [smem:[#allocation15_spill]] }
 0x13c   : > { %s2845_s10 = sld [smem:[#allocation23_spill]] }
 0x141   : > { %p1243_p4 = scmp.ge.s32.totalorder %s2843_s1, 2  ;;  %s917_s30 = sand.u32 1, %s2844_s18  }
 0x142   : > { %p2846_p10 = scmp.ne.s32.totalorder %s2845_s10, 0  ;;  %s918_s0 = scalar_lea.sflag [#allocation3], %s917_s30 }
 0x144   : > { %p1232_p11 = pnand %p1243_p4, %p2846_p10 }
 0x146   : > { %1425 = dma.done.wait (!%p1232_p11), %s918_s0, 128  }
 0x147   : > { %1427 = vsyncadd (!%p1232_p11), %s918_s0, 4294967168  ;;  %s21_s23 = sadd.s32 1, %s2843_s1   ;;  %s2847_s18 = sld [smem:[#allocation16_spill]] }
 0x148   : > { %p18_p0 = scmp.ge.s32.totalorder %s21_s23, 4   ;;  %s2848_s19 = sld [smem:[#allocation17_spill]] }
 0x149   : > { %s2849_s20 = sld [smem:[#allocation24_spill]]  ;;  %s2850_s21 = sld [smem:[#allocation19_spill]] }
 0x14a   : > { %s2851_s22 = sld [smem:[#allocation21_spill]]  ;;  %20 = sbr.rel (!%p18_p0) target bundleno = 14 (0xe), region = 98 }
 0x151   :  { %923 = vsyncpa [#allocation3], 1 }
 0x152   :  { %925 = vsyncpa [#allocation3 + $0x1], 1 }
 0x153   :  { %926 = vsyncpa [#allocation4], 1 }
 0x154   :  { %928 = vsyncpa [#allocation4 + $0x1], 1 }
 0x155   :  { %929 = vsyncpa [#allocation6], 1 }
 0x156   :  { %930 = vsyncpa [#allocation9], 1 }

</bundles_post_ra>
